<compile_context>
chip_gen: v7x
topology: tpu7x:2x2x1
jax: 0.10.0
libtpu: 0.0.40
codegen_flags: <defaults>
</compile_context>

<pallas_src>
import jax
import jax.numpy as jnp
from jax.experimental import pallas as pl
from jax.experimental.pallas import tpu as pltpu

# ---- Small synthetic ViT config (stands in for vit_base_patch16_224, num_classes=0) ----
BATCH = 32
B_TILE = 8                               # images per grid step
IN_CH = 3
IMG = 16
PATCH = 8
NUM_PATCH = (IMG // PATCH) ** 2          # 4
SEQ_REAL = NUM_PATCH + 1                 # 5 real tokens (cls + patches)
SEQ = 8                                  # padded to 8 (3 masked dummy rows per image)
TILE_TOK = B_TILE * SEQ                  # 64 stacked token rows per grid step
HIDDEN = 32                              # backbone.num_features (768 in the real model)
NUM_HEADS = 4
HEAD_DIM = HIDDEN // NUM_HEADS           # 8
MLP_DIM = 4 * HIDDEN                     # 128 (lane-dense)
DEPTH = 2                                # 12 in the real model
NUM_FRUIT = 14
NUM_HEALTH = 2
PPC = IN_CH * PATCH * PATCH              # 192
QKV_PAD = 128                            # 3*HIDDEN = 96 padded to a full 128-lane vreg
HEADS_PAD = 128                          # fused fruit+health logits padded to 128 lanes
LN_EPS = 1e-6
ATTN_SCALE = 1.0 / (HEAD_DIM ** 0.5)
_GELU_C = 0.7978845608028654             # sqrt(2/pi)
MASK_NEG = -1e9


def _ln_noaffine(z):
    # gamma/beta are folded into the following matmul weights (done once in prepare_params).
    mu = jnp.mean(z, axis=-1, keepdims=True)
    zc = z - mu
    var = jnp.mean(zc * zc, axis=-1, keepdims=True)
    return zc * jax.lax.rsqrt(var + LN_EPS)


def _gelu_tanh(x):
    # TODO(synk): timm vit_base uses exact erf-GELU; tanh approximation keeps lowering TPU-safe.
    return 0.5 * x * (1.0 + jnp.tanh(_GELU_C * (x + 0.044715 * x * x * x)))


def vit_kernel(x_ref, pe_w_ref, tok_add_ref, mask_ref,
               qkv_w_ref, qkv_b_ref, proj_w_ref, proj_b_ref,
               fc1_w_ref, fc1_b_ref, fc2_w_ref, fc2_b_ref,
               wcls_ref, bcls_ref, out_ref, tok_ref):
    f32, bf16 = jnp.float32, jnp.bfloat16
    d = pl.program_id(1)                                     # depth ("arbitrary", innermost)

    # ---- Patch embedding on the first depth step; tokens persist in VMEM scratch. ----
    @pl.when(d == 0)
    def _():
        tok_ref[...] = (jnp.dot(x_ref[0], pe_w_ref[...], preferred_element_type=f32)
                        + tok_add_ref[...])

    tokens = tok_ref[...]                                    # (TILE_TOK, HIDDEN) f32
    mask = mask_ref[...]                                     # block-diag + pad-column mask

    # ---- Multi-head self-attention (ln1 affine + q-scale already folded into qkv_w/b). ----
    h = _ln_noaffine(tokens)
    qkv = (jnp.dot(h.astype(bf16), qkv_w_ref[0], preferred_element_type=f32)
           + qkv_b_ref[0]).astype(bf16)                      # one lane-dense (M,128) cast
    attn = jnp.zeros((TILE_TOK, HIDDEN), f32)
    for hh in range(NUM_HEADS):
        s0 = hh * HEAD_DIM
        q = qkv[:, s0:s0 + HEAD_DIM]
        k = qkv[:, HIDDEN + s0:HIDDEN + s0 + HEAD_DIM]
        v = qkv[:, 2 * HIDDEN + s0:2 * HIDDEN + s0 + HEAD_DIM]
        s = jax.lax.dot_general(q, k, (((1,), (1,)), ((), ())),
                                preferred_element_type=f32) + mask     # (M, M)
        m = jnp.max(s, axis=-1, keepdims=True)
        e = jnp.exp(s - m)
        p = e * pl.reciprocal(jnp.sum(e, axis=-1, keepdims=True), approx=True)
        o = jnp.dot(p.astype(bf16), v, preferred_element_type=f32)    # (M, HEAD_DIM)
        # Accumulate through the MXU instead of concatenating 8-lane head slices.
        attn = attn + jnp.dot(o.astype(bf16), proj_w_ref[0, s0:s0 + HEAD_DIM, :],
                              preferred_element_type=f32)
    tokens = tokens + attn + proj_b_ref[0]

    # ---- MLP (ln2 affine folded into fc1). ----
    h2 = _ln_noaffine(tokens)
    f1 = jnp.dot(h2.astype(bf16), fc1_w_ref[0], preferred_element_type=f32) + fc1_b_ref[0]
    tokens = tokens + (jnp.dot(_gelu_tanh(f1).astype(bf16), fc2_w_ref[0],
                               preferred_element_type=f32) + fc2_b_ref[0])
    tok_ref[...] = tokens

    # ---- Classifier heads on the last depth step: strided sublane load of the cls rows,
    #      final-norm affine folded into the fused (fruit|health|pad) 128-lane weight. ----
    @pl.when(d == DEPTH - 1)
    def _():
        feat = tok_ref[pl.ds(0, B_TILE, stride=SEQ), :]      # (B_TILE, HIDDEN) cls rows
        hn = _ln_noaffine(feat)
        out_ref[0] = (jnp.dot(hn.astype(bf16), wcls_ref[...],
                              preferred_element_type=f32) + bcls_ref[...])


def _const_spec(shape):
    zeros = (0,) * len(shape)
    return pl.BlockSpec(shape, lambda i, d, _z=zeros: _z)


def _layer_spec(shape):
    zeros = (0,) * (len(shape) - 1)
    return pl.BlockSpec((1,) + shape[1:], lambda i, d, _z=zeros: (d,) + _z)


@jax.jit
def multi_task_vit(x_nchw, prep):
    f32, bf16 = jnp.float32, jnp.bfloat16
    b, c, hh, ww = x_nchw.shape
    assert b % B_TILE == 0
    nsteps = b // B_TILE
    gh, gw = hh // PATCH, ww // PATCH

    # (B, NUM_PATCH, C*P*P) patches, exactly what Conv2d(kernel=stride=PATCH) consumes.
    patches = (x_nchw.reshape(b, c, gh, PATCH, gw, PATCH)
               .transpose(0, 2, 4, 1, 3, 5)
               .reshape(b, gh * gw, c * PATCH * PATCH))
    # Zero dummy rows at the cls slot and at the SEQ-SEQ_REAL pad slots; stack B_TILE per step.
    aug = jnp.concatenate([jnp.zeros((b, 1, PPC), f32), patches,
                           jnp.zeros((b, SEQ - SEQ_REAL, PPC), f32)], axis=1)
    aug = aug.reshape(nsteps, TILE_TOK, PPC).astype(bf16)

    args = (aug, prep["pe_w"], prep["tok_add"], prep["mask"],
            prep["qkv_w"], prep["qkv_b"], prep["proj_w"], prep["proj_b"],
            prep["fc1_w"], prep["fc1_b"], prep["fc2_w"], prep["fc2_b"],
            prep["wcls"], prep["bcls"])

    in_specs = [pl.BlockSpec((1, TILE_TOK, PPC), lambda i, d: (i, 0, 0)),
                _const_spec(prep["pe_w"].shape),
                _const_spec(prep["tok_add"].shape),
                _const_spec(prep["mask"].shape),
                _layer_spec(prep["qkv_w"].shape), _layer_spec(prep["qkv_b"].shape),
                _layer_spec(prep["proj_w"].shape), _layer_spec(prep["proj_b"].shape),
                _layer_spec(prep["fc1_w"].shape), _layer_spec(prep["fc1_b"].shape),
                _layer_spec(prep["fc2_w"].shape), _layer_spec(prep["fc2_b"].shape),
                _const_spec(prep["wcls"].shape),
                _const_spec(prep["bcls"].shape)]

    out = pl.pallas_call(
        vit_kernel,
        grid=(nsteps, DEPTH),
        in_specs=in_specs,
        out_specs=pl.BlockSpec((1, B_TILE, HEADS_PAD), lambda i, d: (i, 0, 0)),
        out_shape=jax.ShapeDtypeStruct((nsteps, B_TILE, HEADS_PAD), jnp.float32),
        scratch_shapes=[pltpu.VMEM((TILE_TOK, HIDDEN), jnp.float32)],
        compiler_params=pltpu.CompilerParams(
            dimension_semantics=("parallel", "arbitrary"),
            vmem_limit_bytes=48 * 1024 * 1024),
    )(*args)

    logits = out.reshape(b, HEADS_PAD)
    return logits[:, :NUM_FRUIT], logits[:, NUM_FRUIT:NUM_FRUIT + NUM_HEALTH]


def prepare_params(p):
    """One-time (outside the jitted forward) kernel-ready weight prep:
    LN-affine and attention-scale folding in f32, lane padding, head fusion, bf16 cast."""
    f32, bf16 = jnp.float32, jnp.bfloat16

    def fold_ln(g, beta, w, bias):
        # (LN(x)*g + beta) @ w + bias  ==  norm(x) @ (g[:,None]*w) + (beta @ w + bias)
        return g[:, None] * w, beta @ w + bias

    qkv_w_l, qkv_b_l, fc1_w_l, fc1_b_l = [], [], [], []
    for d in range(DEPTH):
        w, bq = fold_ln(p["ln1_g"][d], p["ln1_b"][d], p["qkv_w"][d], p["qkv_b"][d])
        w = w.at[:, :HIDDEN].multiply(ATTN_SCALE)       # fold 1/sqrt(head_dim) into q cols
        bq = bq.at[:HIDDEN].multiply(ATTN_SCALE)
        qkv_w_l.append(jnp.pad(w, ((0, 0), (0, QKV_PAD - 3 * HIDDEN))))
        qkv_b_l.append(jnp.pad(bq, (0, QKV_PAD - 3 * HIDDEN)))
        w1, b1 = fold_ln(p["ln2_g"][d], p["ln2_b"][d], p["fc1_w"][d], p["fc1_b"][d])
        fc1_w_l.append(w1)
        fc1_b_l.append(b1)

    wcls = jnp.concatenate([p["wf"], p["wh"]], axis=1)
    bcls = jnp.concatenate([p["bf"], p["bh"]], axis=1)[0]
    wcls, bcls = fold_ln(p["lnf_g"][0], p["lnf_b"][0], wcls, bcls)
    wcls = jnp.pad(wcls, ((0, 0), (0, HEADS_PAD - NUM_FRUIT - NUM_HEALTH)))
    bcls = jnp.pad(bcls, (0, HEADS_PAD - NUM_FRUIT - NUM_HEALTH))

    # Additive token term: row 0 = cls + pos[0]; patch rows = pe_b + pos[1:]; pad rows = 0.
    cls_row = p["cls"] + p["pos"][0:1]
    patch_rows = p["pe_b"] + p["pos"][1:]
    pad_rows = jnp.zeros((SEQ - SEQ_REAL, HIDDEN), f32)
    tok_add = jnp.tile(jnp.concatenate([cls_row, patch_rows, pad_rows], axis=0), (B_TILE, 1))

    # Attention mask: keys must be real tokens of the same image (block-diag + no pad cols).
    img = jnp.arange(TILE_TOK) // SEQ
    col_real = (jnp.arange(TILE_TOK) % SEQ) < SEQ_REAL
    mask = jnp.where((img[:, None] == img[None, :]) & col_real[None, :],
                     0.0, MASK_NEG).astype(f32)

    return {
        "pe_w": p["pe_w"].astype(bf16),
        "tok_add": tok_add.astype(f32),
        "mask": mask,
        "qkv_w": jnp.stack(qkv_w_l).astype(bf16),                 # (DEPTH, HIDDEN, 128)
        "qkv_b": jnp.stack(qkv_b_l)[:, None, :].astype(f32),      # (DEPTH, 1, 128)
        "proj_w": p["proj_w"].astype(bf16),                       # (DEPTH, HIDDEN, HIDDEN)
        "proj_b": p["proj_b"][:, None, :].astype(f32),            # (DEPTH, 1, HIDDEN)
        "fc1_w": jnp.stack(fc1_w_l).astype(bf16),                 # (DEPTH, HIDDEN, MLP_DIM)
        "fc1_b": jnp.stack(fc1_b_l)[:, None, :].astype(f32),      # (DEPTH, 1, MLP_DIM)
        "fc2_w": p["fc2_w"].astype(bf16),                         # (DEPTH, MLP_DIM, HIDDEN)
        "fc2_b": p["fc2_b"][:, None, :].astype(f32),              # (DEPTH, 1, HIDDEN)
        "wcls": wcls.astype(bf16),                                # (HIDDEN, 128)
        "bcls": bcls[None, :].astype(f32),                        # (1, 128)
    }


def init_params(key):
    ks = iter(jax.random.split(key, 16))
    fn = lambda k, s: 0.02 * jax.random.normal(k, s, jnp.float32)
    z = lambda s: jnp.zeros(s, jnp.float32)
    o = lambda s: jnp.ones(s, jnp.float32)
    return {
        "pe_w": fn(next(ks), (PPC, HIDDEN)), "pe_b": z((1, HIDDEN)),
        "cls": fn(next(ks), (1, HIDDEN)), "pos": fn(next(ks), (SEQ_REAL, HIDDEN)),
        "ln1_g": o((DEPTH, HIDDEN)), "ln1_b": z((DEPTH, HIDDEN)),
        "qkv_w": fn(next(ks), (DEPTH, HIDDEN, 3 * HIDDEN)), "qkv_b": z((DEPTH, 3 * HIDDEN)),
        "proj_w": fn(next(ks), (DEPTH, HIDDEN, HIDDEN)), "proj_b": z((DEPTH, HIDDEN)),
        "ln2_g": o((DEPTH, HIDDEN)), "ln2_b": z((DEPTH, HIDDEN)),
        "fc1_w": fn(next(ks), (DEPTH, HIDDEN, MLP_DIM)), "fc1_b": z((DEPTH, MLP_DIM)),
        "fc2_w": fn(next(ks), (DEPTH, MLP_DIM, HIDDEN)), "fc2_b": z((DEPTH, HIDDEN)),
        "lnf_g": o((1, HIDDEN)), "lnf_b": z((1, HIDDEN)),
        "wf": fn(next(ks), (HIDDEN, NUM_FRUIT)), "bf": z((1, NUM_FRUIT)),
        "wh": fn(next(ks), (HIDDEN, NUM_HEALTH)), "bh": z((1, NUM_HEALTH)),
    }


def reference_forward(x_nchw, p):
    """Pure-JAX reference with the same numerics policy (bf16 matmul operands, f32 accum)."""
    f32, bf16 = jnp.float32, jnp.bfloat16

    def bdot(a, w):
        return jax.lax.dot_general(a.astype(bf16), w.astype(bf16),
                                   (((a.ndim - 1,), (0,)), ((), ())),
                                   preferred_element_type=f32)

    def ln(z, g, bb):
        mu = z.mean(-1, keepdims=True)
        zc = z - mu
        var = (zc * zc).mean(-1, keepdims=True)
        return zc * jax.lax.rsqrt(var + LN_EPS) * g + bb

    b, c, hh, ww = x_nchw.shape
    gh, gw = hh // PATCH, ww // PATCH
    patches = (x_nchw.reshape(b, c, gh, PATCH, gw, PATCH)
               .transpose(0, 2, 4, 1, 3, 5)
               .reshape(b, gh * gw, c * PATCH * PATCH))

    x = bdot(patches, p["pe_w"]) + p["pe_b"][0]
    cls = jnp.broadcast_to(p["cls"].astype(f32)[None], (b, 1, HIDDEN))
    t = jnp.concatenate([cls, x], axis=1) + p["pos"][None]
    for d in range(DEPTH):
        h = ln(t, p["ln1_g"][d], p["ln1_b"][d])
        qkv = bdot(h, p["qkv_w"][d]) + p["qkv_b"][d]
        q, k, v = qkv[..., :HIDDEN], qkv[..., HIDDEN:2 * HIDDEN], qkv[..., 2 * HIDDEN:]
        split = lambda a: a.reshape(b, SEQ_REAL, NUM_HEADS, HEAD_DIM).transpose(0, 2, 1, 3)
        qh, kh, vh = split(q), split(k), split(v)
        s = jnp.einsum("bhqd,bhkd->bhqk", qh.astype(bf16), kh.astype(bf16),
                       preferred_element_type=f32) * ATTN_SCALE
        a = jax.nn.softmax(s, axis=-1)
        o = jnp.einsum("bhqk,bhkd->bhqd", a.astype(bf16), vh.astype(bf16),
                       preferred_element_type=f32)
        o = o.transpose(0, 2, 1, 3).reshape(b, SEQ_REAL, HIDDEN)
        t = t + bdot(o, p["proj_w"][d]) + p["proj_b"][d]
        h2 = ln(t, p["ln2_g"][d], p["ln2_b"][d])
        f1 = bdot(h2, p["fc1_w"][d]) + p["fc1_b"][d]
        t = t + bdot(_gelu_tanh(f1), p["fc2_w"][d]) + p["fc2_b"][d]
    hn = ln(t, p["lnf_g"][0], p["lnf_b"][0])
    feat = hn[:, 0, :]
    return bdot(feat, p["wf"]) + p["bf"][0], bdot(feat, p["wh"]) + p["bh"][0]


if __name__ == "__main__":
    key = jax.random.PRNGKey(0)
    k_x, k_p = jax.random.split(key)
    x = jax.random.normal(k_x, (BATCH, IN_CH, IMG, IMG), jnp.float32)  # NCHW like PyTorch
    params = init_params(k_p)
    prep = prepare_params(params)   # one-time folding/padding, outside the jitted forward

    out_fruit, out_health = multi_task_vit(x, prep)
    jax.block_until_ready((out_fruit, out_health))

    ref_fruit, ref_health = reference_forward(x, params)
    assert out_fruit.shape == (BATCH, NUM_FRUIT)
    assert out_health.shape == (BATCH, NUM_HEALTH)
    assert jnp.allclose(out_fruit, ref_fruit, atol=5e-3, rtol=5e-3), \
        float(jnp.max(jnp.abs(out_fruit - ref_fruit)))
    assert jnp.allclose(out_health, ref_health, atol=5e-3, rtol=5e-3), \
        float(jnp.max(jnp.abs(out_health - ref_health)))
    print("KERNEL_OK")
</pallas_src>

<mosaic_0001>
module attributes {stable_mosaic.version = 11 : i64} {
  func.func @vit_kernel(%arg0: i32, %arg1: i32, %arg2: memref<1x64x192xbf16, #tpu.memory_space<vmem>>, %arg3: memref<192x32xbf16, #tpu.memory_space<vmem>>, %arg4: memref<64x32xf32, #tpu.memory_space<vmem>>, %arg5: memref<64x64xf32, #tpu.memory_space<vmem>>, %arg6: memref<1x32x128xbf16, #tpu.memory_space<vmem>>, %arg7: memref<1x1x128xf32, #tpu.memory_space<vmem>>, %arg8: memref<1x32x32xbf16, #tpu.memory_space<vmem>>, %arg9: memref<1x1x32xf32, #tpu.memory_space<vmem>>, %arg10: memref<1x32x128xbf16, #tpu.memory_space<vmem>>, %arg11: memref<1x1x128xf32, #tpu.memory_space<vmem>>, %arg12: memref<1x128x32xbf16, #tpu.memory_space<vmem>>, %arg13: memref<1x1x32xf32, #tpu.memory_space<vmem>>, %arg14: memref<32x128xbf16, #tpu.memory_space<vmem>>, %arg15: memref<1x128xf32, #tpu.memory_space<vmem>>, %arg16: memref<1x8x128xf32, #tpu.memory_space<vmem>>, %arg17: memref<64x32xf32, #tpu.memory_space<vmem>>) attributes {dimension_semantics = [#tpu.dimension_semantics<parallel>, #tpu.dimension_semantics<arbitrary>], iteration_bounds = array<i64: 4, 2>, scalar_prefetch = 0 : i64, scratch_operands = 1 : i64, tpu.core_type = #tpu.core_type<tc>, window_params = [{transform_indices = @transform_0, window_bounds = array<i64: 1, 64, 192>}, {pipeline_mode = #tpu.pipeline_mode<synchronous>, transform_indices = @transform_1, window_bounds = array<i64: 192, 32>}, {pipeline_mode = #tpu.pipeline_mode<synchronous>, transform_indices = @transform_2, window_bounds = array<i64: 64, 32>}, {pipeline_mode = #tpu.pipeline_mode<synchronous>, transform_indices = @transform_3, window_bounds = array<i64: 64, 64>}, {transform_indices = @transform_4, window_bounds = array<i64: 1, 32, 128>}, {transform_indices = @transform_5, window_bounds = array<i64: 1, 1, 128>}, {transform_indices = @transform_6, window_bounds = array<i64: 1, 32, 32>}, {transform_indices = @transform_7, window_bounds = array<i64: 1, 1, 32>}, {transform_indices = @transform_8, window_bounds = array<i64: 1, 32, 128>}, {transform_indices = @transform_9, window_bounds = array<i64: 1, 1, 128>}, {transform_indices = @transform_10, window_bounds = array<i64: 1, 128, 32>}, {transform_indices = @transform_11, window_bounds = array<i64: 1, 1, 32>}, {pipeline_mode = #tpu.pipeline_mode<synchronous>, transform_indices = @transform_12, window_bounds = array<i64: 32, 128>}, {pipeline_mode = #tpu.pipeline_mode<synchronous>, transform_indices = @transform_13, window_bounds = array<i64: 1, 128>}, {transform_indices = @transform_14, window_bounds = array<i64: 1, 8, 128>}]} {
    %c0_i32 = arith.constant 0 : i32
    %0 = arith.cmpi eq, %arg1, %c0_i32 : i32
    %1 = arith.extui %0 : i1 to i32
    %c0_i32_0 = arith.constant 0 : i32
    %2 = arith.cmpi ne, %1, %c0_i32_0 : i32
    scf.if %2 {
      %c0_74 = arith.constant 0 : index
      %c0_75 = arith.constant 0 : index
      %c0_76 = arith.constant 0 : index
      %174 = vector.load %arg2[%c0_74, %c0_75, %c0_76] : memref<1x64x192xbf16, #tpu.memory_space<vmem>>, vector<1x64x192xbf16>
      %175 = vector.shape_cast %174 : vector<1x64x192xbf16> to vector<64x192xbf16>
      %c0_77 = arith.constant 0 : index
      %c0_78 = arith.constant 0 : index
      %176 = vector.load %arg3[%c0_77, %c0_78] : memref<192x32xbf16, #tpu.memory_space<vmem>>, vector<192x32xbf16>
      %cst_79 = arith.constant dense<0.000000e+00> : vector<64x32xf32>
      %177 = tpu.matmul %175, %176, %cst_79 {dimension_numbers = #tpu.dot_dimension_numbers<[1], [0], [0], [1], [0, 0, 1, 1], [], []>} : vector<64x192xbf16>, vector<192x32xbf16>, vector<64x32xf32> -> vector<64x32xf32>
      %c0_80 = arith.constant 0 : index
      %c0_81 = arith.constant 0 : index
      %178 = vector.load %arg4[%c0_80, %c0_81] : memref<64x32xf32, #tpu.memory_space<vmem>>, vector<64x32xf32>
      %179 = arith.addf %177, %178 : vector<64x32xf32>
      %c0_82 = arith.constant 0 : index
      %c0_83 = arith.constant 0 : index
      %180 = vector.load %arg17[%c0_82, %c0_83] : memref<64x32xf32, #tpu.memory_space<vmem>>, vector<64x32xf32>
      tpu.vector_store %arg17[%c0_82, %c0_83], %179 {strides = array<i32>} : memref<64x32xf32, #tpu.memory_space<vmem>>, vector<64x32xf32>,
    } else {
    }
    %c0 = arith.constant 0 : index
    %c0_1 = arith.constant 0 : index
    %3 = vector.load %arg17[%c0, %c0_1] : memref<64x32xf32, #tpu.memory_space<vmem>>, vector<64x32xf32>
    %c0_2 = arith.constant 0 : index
    %c0_3 = arith.constant 0 : index
    %4 = vector.load %arg5[%c0_2, %c0_3] : memref<64x64xf32, #tpu.memory_space<vmem>>, vector<64x64xf32>
    %cst = arith.constant dense<0.000000e+00> : vector<64xf32>
    %5 = vector.multi_reduction <add>, %3, %cst [1] : vector<64x32xf32> to vector<64xf32>
    %6 = vector.shape_cast %5 : vector<64xf32> to vector<64x1xf32>
    %cst_4 = arith.constant 3.200000e+01 : f32
    %7 = vector.broadcast %cst_4 : f32 to vector<64x1xf32>
    %8 = arith.divf %6, %7 : vector<64x1xf32>
    %9 = vector.broadcast %8 : vector<64x1xf32> to vector<64x32xf32>
    %10 = arith.subf %3, %9 : vector<64x32xf32>
    %11 = arith.mulf %10, %10 : vector<64x32xf32>
    %cst_5 = arith.constant dense<0.000000e+00> : vector<64xf32>
    %12 = vector.multi_reduction <add>, %11, %cst_5 [1] : vector<64x32xf32> to vector<64xf32>
    %13 = vector.shape_cast %12 : vector<64xf32> to vector<64x1xf32>
    %cst_6 = arith.constant 3.200000e+01 : f32
    %14 = vector.broadcast %cst_6 : f32 to vector<64x1xf32>
    %15 = arith.divf %13, %14 : vector<64x1xf32>
    %cst_7 = arith.constant 9.99999997E-7 : f32
    %16 = vector.broadcast %cst_7 : f32 to vector<64x1xf32>
    %17 = arith.addf %15, %16 : vector<64x1xf32>
    %18 = math.rsqrt %17 : vector<64x1xf32>
    %19 = vector.broadcast %18 : vector<64x1xf32> to vector<64x32xf32>
    %20 = arith.mulf %10, %19 : vector<64x32xf32>
    %21 = arith.truncf %20 : vector<64x32xf32> to vector<64x32xbf16>
    %c0_8 = arith.constant 0 : index
    %c0_9 = arith.constant 0 : index
    %c0_10 = arith.constant 0 : index
    %22 = vector.load %arg6[%c0_8, %c0_9, %c0_10] : memref<1x32x128xbf16, #tpu.memory_space<vmem>>, vector<1x32x128xbf16>
    %23 = vector.shape_cast %22 : vector<1x32x128xbf16> to vector<32x128xbf16>
    %cst_11 = arith.constant dense<0.000000e+00> : vector<64x128xf32>
    %24 = tpu.matmul %21, %23, %cst_11 {dimension_numbers = #tpu.dot_dimension_numbers<[1], [0], [0], [1], [0, 0, 1, 1], [], []>} : vector<64x32xbf16>, vector<32x128xbf16>, vector<64x128xf32> -> vector<64x128xf32>
    %c0_12 = arith.constant 0 : index
    %c0_13 = arith.constant 0 : index
    %c0_14 = arith.constant 0 : index
    %25 = vector.load %arg7[%c0_12, %c0_13, %c0_14] : memref<1x1x128xf32, #tpu.memory_space<vmem>>, vector<1x1x128xf32>
    %26 = vector.shape_cast %25 : vector<1x1x128xf32> to vector<1x128xf32>
    %27 = vector.broadcast %26 : vector<1x128xf32> to vector<64x128xf32>
    %28 = arith.addf %24, %27 : vector<64x128xf32>
    %29 = arith.truncf %28 : vector<64x128xf32> to vector<64x128xbf16>
    %cst_15 = arith.constant 0.000000e+00 : f32
    %30 = vector.broadcast %cst_15 : f32 to vector<64x32xf32>
    %31 = vector.extract_strided_slice %29 {offsets = [0, 0], sizes = [64, 8], strides = [1, 1]} : vector<64x128xbf16> to vector<64x8xbf16>
    %32 = vector.extract_strided_slice %29 {offsets = [0, 32], sizes = [64, 8], strides = [1, 1]} : vector<64x128xbf16> to vector<64x8xbf16>
    %33 = vector.extract_strided_slice %29 {offsets = [0, 64], sizes = [64, 8], strides = [1, 1]} : vector<64x128xbf16> to vector<64x8xbf16>
    %cst_16 = arith.constant dense<0.000000e+00> : vector<64x64xf32>
    %34 = tpu.matmul %31, %32, %cst_16 {dimension_numbers = #tpu.dot_dimension_numbers<[1], [1], [0], [0], [0, 0, 1, 0], [], []>} : vector<64x8xbf16>, vector<64x8xbf16>, vector<64x64xf32> -> vector<64x64xf32>
    %35 = arith.addf %34, %4 : vector<64x64xf32>
    %cst_17 = arith.constant dense<0xFF800000> : vector<64xf32>
    %36 = vector.multi_reduction <maximumf>, %35, %cst_17 [1] : vector<64x64xf32> to vector<64xf32>
    %37 = vector.shape_cast %36 : vector<64xf32> to vector<64x1xf32>
    %38 = vector.broadcast %37 : vector<64x1xf32> to vector<64x64xf32>
    %39 = arith.subf %35, %38 : vector<64x64xf32>
    %40 = math.exp %39 : vector<64x64xf32>
    %cst_18 = arith.constant dense<0.000000e+00> : vector<64xf32>
    %41 = vector.multi_reduction <add>, %40, %cst_18 [1] : vector<64x64xf32> to vector<64xf32>
    %42 = vector.shape_cast %41 : vector<64xf32> to vector<64x1xf32>
    %43 = tpu.reciprocal %42 {approx = true} : vector<64x1xf32> -> vector<64x1xf32>
    %44 = vector.broadcast %43 : vector<64x1xf32> to vector<64x64xf32>
    %45 = arith.mulf %40, %44 : vector<64x64xf32>
    %46 = arith.truncf %45 : vector<64x64xf32> to vector<64x64xbf16>
    %cst_19 = arith.constant dense<0.000000e+00> : vector<64x8xf32>
    %47 = tpu.matmul %46, %33, %cst_19 {dimension_numbers = #tpu.dot_dimension_numbers<[1], [0], [0], [1], [0, 0, 1, 1], [], []>} : vector<64x64xbf16>, vector<64x8xbf16>, vector<64x8xf32> -> vector<64x8xf32>
    %48 = arith.truncf %47 : vector<64x8xf32> to vector<64x8xbf16>
    %c0_20 = arith.constant 0 : index
    %c0_21 = arith.constant 0 : index
    %c0_22 = arith.constant 0 : index
    %49 = vector.load %arg8[%c0_20, %c0_21, %c0_22] : memref<1x32x32xbf16, #tpu.memory_space<vmem>>, vector<1x8x32xbf16>
    %50 = vector.shape_cast %49 : vector<1x8x32xbf16> to vector<8x32xbf16>
    %cst_23 = arith.constant dense<0.000000e+00> : vector<64x32xf32>
    %51 = tpu.matmul %48, %50, %cst_23 {dimension_numbers = #tpu.dot_dimension_numbers<[1], [0], [0], [1], [0, 0, 1, 1], [], []>} : vector<64x8xbf16>, vector<8x32xbf16>, vector<64x32xf32> -> vector<64x32xf32>
    %52 = arith.addf %30, %51 : vector<64x32xf32>
    %53 = vector.extract_strided_slice %29 {offsets = [0, 8], sizes = [64, 8], strides = [1, 1]} : vector<64x128xbf16> to vector<64x8xbf16>
    %54 = vector.extract_strided_slice %29 {offsets = [0, 40], sizes = [64, 8], strides = [1, 1]} : vector<64x128xbf16> to vector<64x8xbf16>
    %55 = vector.extract_strided_slice %29 {offsets = [0, 72], sizes = [64, 8], strides = [1, 1]} : vector<64x128xbf16> to vector<64x8xbf16>
    %cst_24 = arith.constant dense<0.000000e+00> : vector<64x64xf32>
    %56 = tpu.matmul %53, %54, %cst_24 {dimension_numbers = #tpu.dot_dimension_numbers<[1], [1], [0], [0], [0, 0, 1, 0], [], []>} : vector<64x8xbf16>, vector<64x8xbf16>, vector<64x64xf32> -> vector<64x64xf32>
    %57 = arith.addf %56, %4 : vector<64x64xf32>
    %cst_25 = arith.constant dense<0xFF800000> : vector<64xf32>
    %58 = vector.multi_reduction <maximumf>, %57, %cst_25 [1] : vector<64x64xf32> to vector<64xf32>
    %59 = vector.shape_cast %58 : vector<64xf32> to vector<64x1xf32>
    %60 = vector.broadcast %59 : vector<64x1xf32> to vector<64x64xf32>
    %61 = arith.subf %57, %60 : vector<64x64xf32>
    %62 = math.exp %61 : vector<64x64xf32>
    %cst_26 = arith.constant dense<0.000000e+00> : vector<64xf32>
    %63 = vector.multi_reduction <add>, %62, %cst_26 [1] : vector<64x64xf32> to vector<64xf32>
    %64 = vector.shape_cast %63 : vector<64xf32> to vector<64x1xf32>
    %65 = tpu.reciprocal %64 {approx = true} : vector<64x1xf32> -> vector<64x1xf32>
    %66 = vector.broadcast %65 : vector<64x1xf32> to vector<64x64xf32>
    %67 = arith.mulf %62, %66 : vector<64x64xf32>
    %68 = arith.truncf %67 : vector<64x64xf32> to vector<64x64xbf16>
    %cst_27 = arith.constant dense<0.000000e+00> : vector<64x8xf32>
    %69 = tpu.matmul %68, %55, %cst_27 {dimension_numbers = #tpu.dot_dimension_numbers<[1], [0], [0], [1], [0, 0, 1, 1], [], []>} : vector<64x64xbf16>, vector<64x8xbf16>, vector<64x8xf32> -> vector<64x8xf32>
    %70 = arith.truncf %69 : vector<64x8xf32> to vector<64x8xbf16>
    %c0_28 = arith.constant 0 : index
    %c8 = arith.constant 8 : index
    %c0_29 = arith.constant 0 : index
    %71 = vector.load %arg8[%c0_28, %c8, %c0_29] : memref<1x32x32xbf16, #tpu.memory_space<vmem>>, vector<1x8x32xbf16>
    %72 = vector.shape_cast %71 : vector<1x8x32xbf16> to vector<8x32xbf16>
    %cst_30 = arith.constant dense<0.000000e+00> : vector<64x32xf32>
    %73 = tpu.matmul %70, %72, %cst_30 {dimension_numbers = #tpu.dot_dimension_numbers<[1], [0], [0], [1], [0, 0, 1, 1], [], []>} : vector<64x8xbf16>, vector<8x32xbf16>, vector<64x32xf32> -> vector<64x32xf32>
    %74 = arith.addf %52, %73 : vector<64x32xf32>
    %75 = vector.extract_strided_slice %29 {offsets = [0, 16], sizes = [64, 8], strides = [1, 1]} : vector<64x128xbf16> to vector<64x8xbf16>
    %76 = vector.extract_strided_slice %29 {offsets = [0, 48], sizes = [64, 8], strides = [1, 1]} : vector<64x128xbf16> to vector<64x8xbf16>
    %77 = vector.extract_strided_slice %29 {offsets = [0, 80], sizes = [64, 8], strides = [1, 1]} : vector<64x128xbf16> to vector<64x8xbf16>
    %cst_31 = arith.constant dense<0.000000e+00> : vector<64x64xf32>
    %78 = tpu.matmul %75, %76, %cst_31 {dimension_numbers = #tpu.dot_dimension_numbers<[1], [1], [0], [0], [0, 0, 1, 0], [], []>} : vector<64x8xbf16>, vector<64x8xbf16>, vector<64x64xf32> -> vector<64x64xf32>
    %79 = arith.addf %78, %4 : vector<64x64xf32>
    %cst_32 = arith.constant dense<0xFF800000> : vector<64xf32>
    %80 = vector.multi_reduction <maximumf>, %79, %cst_32 [1] : vector<64x64xf32> to vector<64xf32>
    %81 = vector.shape_cast %80 : vector<64xf32> to vector<64x1xf32>
    %82 = vector.broadcast %81 : vector<64x1xf32> to vector<64x64xf32>
    %83 = arith.subf %79, %82 : vector<64x64xf32>
    %84 = math.exp %83 : vector<64x64xf32>
    %cst_33 = arith.constant dense<0.000000e+00> : vector<64xf32>
    %85 = vector.multi_reduction <add>, %84, %cst_33 [1] : vector<64x64xf32> to vector<64xf32>
    %86 = vector.shape_cast %85 : vector<64xf32> to vector<64x1xf32>
    %87 = tpu.reciprocal %86 {approx = true} : vector<64x1xf32> -> vector<64x1xf32>
    %88 = vector.broadcast %87 : vector<64x1xf32> to vector<64x64xf32>
    %89 = arith.mulf %84, %88 : vector<64x64xf32>
    %90 = arith.truncf %89 : vector<64x64xf32> to vector<64x64xbf16>
    %cst_34 = arith.constant dense<0.000000e+00> : vector<64x8xf32>
    %91 = tpu.matmul %90, %77, %cst_34 {dimension_numbers = #tpu.dot_dimension_numbers<[1], [0], [0], [1], [0, 0, 1, 1], [], []>} : vector<64x64xbf16>, vector<64x8xbf16>, vector<64x8xf32> -> vector<64x8xf32>
    %92 = arith.truncf %91 : vector<64x8xf32> to vector<64x8xbf16>
    %c0_35 = arith.constant 0 : index
    %c16 = arith.constant 16 : index
    %c0_36 = arith.constant 0 : index
    %93 = vector.load %arg8[%c0_35, %c16, %c0_36] : memref<1x32x32xbf16, #tpu.memory_space<vmem>>, vector<1x8x32xbf16>
    %94 = vector.shape_cast %93 : vector<1x8x32xbf16> to vector<8x32xbf16>
    %cst_37 = arith.constant dense<0.000000e+00> : vector<64x32xf32>
    %95 = tpu.matmul %92, %94, %cst_37 {dimension_numbers = #tpu.dot_dimension_numbers<[1], [0], [0], [1], [0, 0, 1, 1], [], []>} : vector<64x8xbf16>, vector<8x32xbf16>, vector<64x32xf32> -> vector<64x32xf32>
    %96 = arith.addf %74, %95 : vector<64x32xf32>
    %97 = vector.extract_strided_slice %29 {offsets = [0, 24], sizes = [64, 8], strides = [1, 1]} : vector<64x128xbf16> to vector<64x8xbf16>
    %98 = vector.extract_strided_slice %29 {offsets = [0, 56], sizes = [64, 8], strides = [1, 1]} : vector<64x128xbf16> to vector<64x8xbf16>
    %99 = vector.extract_strided_slice %29 {offsets = [0, 88], sizes = [64, 8], strides = [1, 1]} : vector<64x128xbf16> to vector<64x8xbf16>
    %cst_38 = arith.constant dense<0.000000e+00> : vector<64x64xf32>
    %100 = tpu.matmul %97, %98, %cst_38 {dimension_numbers = #tpu.dot_dimension_numbers<[1], [1], [0], [0], [0, 0, 1, 0], [], []>} : vector<64x8xbf16>, vector<64x8xbf16>, vector<64x64xf32> -> vector<64x64xf32>
    %101 = arith.addf %100, %4 : vector<64x64xf32>
    %cst_39 = arith.constant dense<0xFF800000> : vector<64xf32>
    %102 = vector.multi_reduction <maximumf>, %101, %cst_39 [1] : vector<64x64xf32> to vector<64xf32>
    %103 = vector.shape_cast %102 : vector<64xf32> to vector<64x1xf32>
    %104 = vector.broadcast %103 : vector<64x1xf32> to vector<64x64xf32>
    %105 = arith.subf %101, %104 : vector<64x64xf32>
    %106 = math.exp %105 : vector<64x64xf32>
    %cst_40 = arith.constant dense<0.000000e+00> : vector<64xf32>
    %107 = vector.multi_reduction <add>, %106, %cst_40 [1] : vector<64x64xf32> to vector<64xf32>
    %108 = vector.shape_cast %107 : vector<64xf32> to vector<64x1xf32>
    %109 = tpu.reciprocal %108 {approx = true} : vector<64x1xf32> -> vector<64x1xf32>
    %110 = vector.broadcast %109 : vector<64x1xf32> to vector<64x64xf32>
    %111 = arith.mulf %106, %110 : vector<64x64xf32>
    %112 = arith.truncf %111 : vector<64x64xf32> to vector<64x64xbf16>
    %cst_41 = arith.constant dense<0.000000e+00> : vector<64x8xf32>
    %113 = tpu.matmul %112, %99, %cst_41 {dimension_numbers = #tpu.dot_dimension_numbers<[1], [0], [0], [1], [0, 0, 1, 1], [], []>} : vector<64x64xbf16>, vector<64x8xbf16>, vector<64x8xf32> -> vector<64x8xf32>
    %114 = arith.truncf %113 : vector<64x8xf32> to vector<64x8xbf16>
    %c0_42 = arith.constant 0 : index
    %c24 = arith.constant 24 : index
    %c0_43 = arith.constant 0 : index
    %115 = vector.load %arg8[%c0_42, %c24, %c0_43] : memref<1x32x32xbf16, #tpu.memory_space<vmem>>, vector<1x8x32xbf16>
    %116 = vector.shape_cast %115 : vector<1x8x32xbf16> to vector<8x32xbf16>
    %cst_44 = arith.constant dense<0.000000e+00> : vector<64x32xf32>
    %117 = tpu.matmul %114, %116, %cst_44 {dimension_numbers = #tpu.dot_dimension_numbers<[1], [0], [0], [1], [0, 0, 1, 1], [], []>} : vector<64x8xbf16>, vector<8x32xbf16>, vector<64x32xf32> -> vector<64x32xf32>
    %118 = arith.addf %96, %117 : vector<64x32xf32>
    %119 = arith.addf %3, %118 : vector<64x32xf32>
    %c0_45 = arith.constant 0 : index
    %c0_46 = arith.constant 0 : index
    %c0_47 = arith.constant 0 : index
    %120 = vector.load %arg9[%c0_45, %c0_46, %c0_47] : memref<1x1x32xf32, #tpu.memory_space<vmem>>, vector<1x1x32xf32>
    %121 = vector.shape_cast %120 : vector<1x1x32xf32> to vector<1x32xf32>
    %122 = vector.broadcast %121 : vector<1x32xf32> to vector<64x32xf32>
    %123 = arith.addf %119, %122 : vector<64x32xf32>
    %cst_48 = arith.constant dense<0.000000e+00> : vector<64xf32>
    %124 = vector.multi_reduction <add>, %123, %cst_48 [1] : vector<64x32xf32> to vector<64xf32>
    %125 = vector.shape_cast %124 : vector<64xf32> to vector<64x1xf32>
    %cst_49 = arith.constant 3.200000e+01 : f32
    %126 = vector.broadcast %cst_49 : f32 to vector<64x1xf32>
    %127 = arith.divf %125, %126 : vector<64x1xf32>
    %128 = vector.broadcast %127 : vector<64x1xf32> to vector<64x32xf32>
    %129 = arith.subf %123, %128 : vector<64x32xf32>
    %130 = arith.mulf %129, %129 : vector<64x32xf32>
    %cst_50 = arith.constant dense<0.000000e+00> : vector<64xf32>
    %131 = vector.multi_reduction <add>, %130, %cst_50 [1] : vector<64x32xf32> to vector<64xf32>
    %132 = vector.shape_cast %131 : vector<64xf32> to vector<64x1xf32>
    %cst_51 = arith.constant 3.200000e+01 : f32
    %133 = vector.broadcast %cst_51 : f32 to vector<64x1xf32>
    %134 = arith.divf %132, %133 : vector<64x1xf32>
    %cst_52 = arith.constant 9.99999997E-7 : f32
    %135 = vector.broadcast %cst_52 : f32 to vector<64x1xf32>
    %136 = arith.addf %134, %135 : vector<64x1xf32>
    %137 = math.rsqrt %136 : vector<64x1xf32>
    %138 = vector.broadcast %137 : vector<64x1xf32> to vector<64x32xf32>
    %139 = arith.mulf %129, %138 : vector<64x32xf32>
    %140 = arith.truncf %139 : vector<64x32xf32> to vector<64x32xbf16>
    %c0_53 = arith.constant 0 : index
    %c0_54 = arith.constant 0 : index
    %c0_55 = arith.constant 0 : index
    %141 = vector.load %arg10[%c0_53, %c0_54, %c0_55] : memref<1x32x128xbf16, #tpu.memory_space<vmem>>, vector<1x32x128xbf16>
    %142 = vector.shape_cast %141 : vector<1x32x128xbf16> to vector<32x128xbf16>
    %cst_56 = arith.constant dense<0.000000e+00> : vector<64x128xf32>
    %143 = tpu.matmul %140, %142, %cst_56 {dimension_numbers = #tpu.dot_dimension_numbers<[1], [0], [0], [1], [0, 0, 1, 1], [], []>} : vector<64x32xbf16>, vector<32x128xbf16>, vector<64x128xf32> -> vector<64x128xf32>
    %c0_57 = arith.constant 0 : index
    %c0_58 = arith.constant 0 : index
    %c0_59 = arith.constant 0 : index
    %144 = vector.load %arg11[%c0_57, %c0_58, %c0_59] : memref<1x1x128xf32, #tpu.memory_space<vmem>>, vector<1x1x128xf32>
    %145 = vector.shape_cast %144 : vector<1x1x128xf32> to vector<1x128xf32>
    %146 = vector.broadcast %145 : vector<1x128xf32> to vector<64x128xf32>
    %147 = arith.addf %143, %146 : vector<64x128xf32>
    %cst_60 = arith.constant 5.000000e-01 : f32
    %148 = vector.broadcast %cst_60 : f32 to vector<64x128xf32>
    %149 = arith.mulf %148, %147 : vector<64x128xf32>
    %cst_61 = arith.constant 4.471500e-02 : f32
    %150 = vector.broadcast %cst_61 : f32 to vector<64x128xf32>
    %151 = arith.mulf %150, %147 : vector<64x128xf32>
    %152 = arith.mulf %151, %147 : vector<64x128xf32>
    %153 = arith.mulf %152, %147 : vector<64x128xf32>
    %154 = arith.addf %147, %153 : vector<64x128xf32>
    %cst_62 = arith.constant 0.797884583 : f32
    %155 = vector.broadcast %cst_62 : f32 to vector<64x128xf32>
    %156 = arith.mulf %155, %154 : vector<64x128xf32>
    %157 = math.tanh %156 : vector<64x128xf32>
    %cst_63 = arith.constant 1.000000e+00 : f32
    %158 = vector.broadcast %cst_63 : f32 to vector<64x128xf32>
    %159 = arith.addf %158, %157 : vector<64x128xf32>
    %160 = arith.mulf %149, %159 : vector<64x128xf32>
    %161 = arith.truncf %160 : vector<64x128xf32> to vector<64x128xbf16>
    %c0_64 = arith.constant 0 : index
    %c0_65 = arith.constant 0 : index
    %c0_66 = arith.constant 0 : index
    %162 = vector.load %arg12[%c0_64, %c0_65, %c0_66] : memref<1x128x32xbf16, #tpu.memory_space<vmem>>, vector<1x128x32xbf16>
    %163 = vector.shape_cast %162 : vector<1x128x32xbf16> to vector<128x32xbf16>
    %cst_67 = arith.constant dense<0.000000e+00> : vector<64x32xf32>
    %164 = tpu.matmul %161, %163, %cst_67 {dimension_numbers = #tpu.dot_dimension_numbers<[1], [0], [0], [1], [0, 0, 1, 1], [], []>} : vector<64x128xbf16>, vector<128x32xbf16>, vector<64x32xf32> -> vector<64x32xf32>
    %c0_68 = arith.constant 0 : index
    %c0_69 = arith.constant 0 : index
    %c0_70 = arith.constant 0 : index
    %165 = vector.load %arg13[%c0_68, %c0_69, %c0_70] : memref<1x1x32xf32, #tpu.memory_space<vmem>>, vector<1x1x32xf32>
    %166 = vector.shape_cast %165 : vector<1x1x32xf32> to vector<1x32xf32>
    %167 = vector.broadcast %166 : vector<1x32xf32> to vector<64x32xf32>
    %168 = arith.addf %164, %167 : vector<64x32xf32>
    %169 = arith.addf %123, %168 : vector<64x32xf32>
    %c0_71 = arith.constant 0 : index
    %c0_72 = arith.constant 0 : index
    %170 = vector.load %arg17[%c0_71, %c0_72] : memref<64x32xf32, #tpu.memory_space<vmem>>, vector<64x32xf32>
    tpu.vector_store %arg17[%c0_71, %c0_72], %169 {strides = array<i32>} : memref<64x32xf32, #tpu.memory_space<vmem>>, vector<64x32xf32>,
    %c1_i32 = arith.constant 1 : i32
    %171 = arith.cmpi eq, %arg1, %c1_i32 : i32
    %172 = arith.extui %171 : i1 to i32
    %c0_i32_73 = arith.constant 0 : i32
    %173 = arith.cmpi ne, %172, %c0_i32_73 : i32
    scf.if %173 {
      %c0_74 = arith.constant 0 : index
      %c0_75 = arith.constant 0 : index
      %174 = tpu.strided_load %arg17[%c0_74, %c0_75] {strides = array<i32: 8, 1>} : memref<64x32xf32, #tpu.memory_space<vmem>>, vector<8x32xf32>
      %cst_76 = arith.constant dense<0.000000e+00> : vector<8xf32>
      %175 = vector.multi_reduction <add>, %174, %cst_76 [1] : vector<8x32xf32> to vector<8xf32>
      %176 = vector.shape_cast %175 : vector<8xf32> to vector<8x1xf32>
      %cst_77 = arith.constant 3.200000e+01 : f32
      %177 = vector.broadcast %cst_77 : f32 to vector<8x1xf32>
      %178 = arith.divf %176, %177 : vector<8x1xf32>
      %179 = vector.broadcast %178 : vector<8x1xf32> to vector<8x32xf32>
      %180 = arith.subf %174, %179 : vector<8x32xf32>
      %181 = arith.mulf %180, %180 : vector<8x32xf32>
      %cst_78 = arith.constant dense<0.000000e+00> : vector<8xf32>
      %182 = vector.multi_reduction <add>, %181, %cst_78 [1] : vector<8x32xf32> to vector<8xf32>
      %183 = vector.shape_cast %182 : vector<8xf32> to vector<8x1xf32>
      %cst_79 = arith.constant 3.200000e+01 : f32
      %184 = vector.broadcast %cst_79 : f32 to vector<8x1xf32>
      %185 = arith.divf %183, %184 : vector<8x1xf32>
      %cst_80 = arith.constant 9.99999997E-7 : f32
      %186 = vector.broadcast %cst_80 : f32 to vector<8x1xf32>
      %187 = arith.addf %185, %186 : vector<8x1xf32>
      %188 = math.rsqrt %187 : vector<8x1xf32>
      %189 = vector.broadcast %188 : vector<8x1xf32> to vector<8x32xf32>
      %190 = arith.mulf %180, %189 : vector<8x32xf32>
      %191 = arith.truncf %190 : vector<8x32xf32> to vector<8x32xbf16>
      %c0_81 = arith.constant 0 : index
      %c0_82 = arith.constant 0 : index
      %192 = vector.load %arg14[%c0_81, %c0_82] : memref<32x128xbf16, #tpu.memory_space<vmem>>, vector<32x128xbf16>
      %cst_83 = arith.constant dense<0.000000e+00> : vector<8x128xf32>
      %193 = tpu.matmul %191, %192, %cst_83 {dimension_numbers = #tpu.dot_dimension_numbers<[1], [0], [0], [1], [0, 0, 1, 1], [], []>} : vector<8x32xbf16>, vector<32x128xbf16>, vector<8x128xf32> -> vector<8x128xf32>
      %c0_84 = arith.constant 0 : index
      %c0_85 = arith.constant 0 : index
      %194 = vector.load %arg15[%c0_84, %c0_85] : memref<1x128xf32, #tpu.memory_space<vmem>>, vector<1x128xf32>
      %195 = vector.broadcast %194 : vector<1x128xf32> to vector<8x128xf32>
      %196 = arith.addf %193, %195 : vector<8x128xf32>
      %c0_86 = arith.constant 0 : index
      %c0_87 = arith.constant 0 : index
      %c0_88 = arith.constant 0 : index
      %197 = vector.load %arg16[%c0_86, %c0_87, %c0_88] : memref<1x8x128xf32, #tpu.memory_space<vmem>>, vector<1x8x128xf32>
      %198 = vector.shape_cast %197 : vector<1x8x128xf32> to vector<8x128xf32>
      %199 = vector.shape_cast %196 : vector<8x128xf32> to vector<1x8x128xf32>
      tpu.vector_store %arg16[%c0_86, %c0_87, %c0_88], %199 {strides = array<i32>} : memref<1x8x128xf32, #tpu.memory_space<vmem>>, vector<1x8x128xf32>,
    } else {
    }
    return
  }
  func.func @transform_0(%arg0: i32, %arg1: i32) -> (i32, i32, i32) {
    %c0_i32 = arith.constant 0 : i32
    %c0_i32_0 = arith.constant 0 : i32
    %c0_i32_1 = arith.constant 0 : i32
    return %arg0, %c0_i32, %c0_i32_0 : i32, i32, i32
  }
  func.func @transform_1(%arg0: i32, %arg1: i32) -> (i32, i32) {
    %c0_i32 = arith.constant 0 : i32
    %c0_i32_0 = arith.constant 0 : i32
    %c0_i32_1 = arith.constant 0 : i32
    return %c0_i32, %c0_i32_0 : i32, i32
  }
  func.func @transform_2(%arg0: i32, %arg1: i32) -> (i32, i32) {
    %c0_i32 = arith.constant 0 : i32
    %c0_i32_0 = arith.constant 0 : i32
    %c0_i32_1 = arith.constant 0 : i32
    return %c0_i32, %c0_i32_0 : i32, i32
  }
  func.func @transform_3(%arg0: i32, %arg1: i32) -> (i32, i32) {
    %c0_i32 = arith.constant 0 : i32
    %c0_i32_0 = arith.constant 0 : i32
    %c0_i32_1 = arith.constant 0 : i32
    return %c0_i32, %c0_i32_0 : i32, i32
  }
  func.func @transform_4(%arg0: i32, %arg1: i32) -> (i32, i32, i32) {
    %c0_i32 = arith.constant 0 : i32
    %c0_i32_0 = arith.constant 0 : i32
    %c0_i32_1 = arith.constant 0 : i32
    return %arg1, %c0_i32, %c0_i32_0 : i32, i32, i32
  }
  func.func @transform_5(%arg0: i32, %arg1: i32) -> (i32, i32, i32) {
    %c0_i32 = arith.constant 0 : i32
    %c0_i32_0 = arith.constant 0 : i32
    %c0_i32_1 = arith.constant 0 : i32
    return %arg1, %c0_i32, %c0_i32_0 : i32, i32, i32
  }
  func.func @transform_6(%arg0: i32, %arg1: i32) -> (i32, i32, i32) {
    %c0_i32 = arith.constant 0 : i32
    %c0_i32_0 = arith.constant 0 : i32
    %c0_i32_1 = arith.constant 0 : i32
    return %arg1, %c0_i32, %c0_i32_0 : i32, i32, i32
  }
  func.func @transform_7(%arg0: i32, %arg1: i32) -> (i32, i32, i32) {
    %c0_i32 = arith.constant 0 : i32
    %c0_i32_0 = arith.constant 0 : i32
    %c0_i32_1 = arith.constant 0 : i32
    return %arg1, %c0_i32, %c0_i32_0 : i32, i32, i32
  }
  func.func @transform_8(%arg0: i32, %arg1: i32) -> (i32, i32, i32) {
    %c0_i32 = arith.constant 0 : i32
    %c0_i32_0 = arith.constant 0 : i32
    %c0_i32_1 = arith.constant 0 : i32
    return %arg1, %c0_i32, %c0_i32_0 : i32, i32, i32
  }
  func.func @transform_9(%arg0: i32, %arg1: i32) -> (i32, i32, i32) {
    %c0_i32 = arith.constant 0 : i32
    %c0_i32_0 = arith.constant 0 : i32
    %c0_i32_1 = arith.constant 0 : i32
    return %arg1, %c0_i32, %c0_i32_0 : i32, i32, i32
  }
  func.func @transform_10(%arg0: i32, %arg1: i32) -> (i32, i32, i32) {
    %c0_i32 = arith.constant 0 : i32
    %c0_i32_0 = arith.constant 0 : i32
    %c0_i32_1 = arith.constant 0 : i32
    return %arg1, %c0_i32, %c0_i32_0 : i32, i32, i32
  }
  func.func @transform_11(%arg0: i32, %arg1: i32) -> (i32, i32, i32) {
    %c0_i32 = arith.constant 0 : i32
    %c0_i32_0 = arith.constant 0 : i32
    %c0_i32_1 = arith.constant 0 : i32
    return %arg1, %c0_i32, %c0_i32_0 : i32, i32, i32
  }
  func.func @transform_12(%arg0: i32, %arg1: i32) -> (i32, i32) {
    %c0_i32 = arith.constant 0 : i32
    %c0_i32_0 = arith.constant 0 : i32
    %c0_i32_1 = arith.constant 0 : i32
    return %c0_i32, %c0_i32_0 : i32, i32
  }
  func.func @transform_13(%arg0: i32, %arg1: i32) -> (i32, i32) {
    %c0_i32 = arith.constant 0 : i32
    %c0_i32_0 = arith.constant 0 : i32
    %c0_i32_1 = arith.constant 0 : i32
    return %c0_i32, %c0_i32_0 : i32, i32
  }
  func.func @transform_14(%arg0: i32, %arg1: i32) -> (i32, i32, i32) {
    %c0_i32 = arith.constant 0 : i32
    %c0_i32_0 = arith.constant 0 : i32
    %c0_i32_1 = arith.constant 0 : i32
    return %arg0, %c0_i32, %c0_i32_0 : i32, i32, i32
  }
}

</mosaic_0001>

<bundles_post_ra>
// kernel: multi_task_vit.1
= control target key start
LH: loop header
LB: loop body
LE: loop exit
PB: predicated region body
PF: predicated region fallthrough
CT: control target
= control target key end

     0   :  { %s4221_s29 = smov 0   ;;  %s4223_s30 = smov 0   ;;  %s5233_s0 = inlined_call_operand.vmem [shape: bf16[4,64,192], index: 0, kind: input, shape index: {}]   ;;  %s5234_s1 = inlined_call_operand.vmem [shape: bf16[192,32], index: 1, kind: input, shape index: {}]   ;;  %s5235_s2 = inlined_call_operand.vmem [shape: f32[64,32], index: 2, kind: input, shape index: {}]   ;;  %s5236_s3 = inlined_call_operand.vmem [shape: f32[64,64], index: 3, kind: input, shape index: {}]   ;;  %s5237_s4 = inlined_call_operand.vmem [shape: bf16[2,32,128], index: 4, kind: input, shape index: {}]   ;;  %s5238_s5 = inlined_call_operand.vmem [shape: f32[2,1,128], index: 5, kind: input, shape index: {}]   ;;  %s5239_s6 = inlined_call_operand.vmem [shape: bf16[2,32,32], index: 6, kind: input, shape index: {}]   ;;  %s5240_s7 = inlined_call_operand.vmem [shape: f32[2,1,32], index: 7, kind: input, shape index: {}]   ;;  %s5241_s8 = inlined_call_operand.vmem [shape: bf16[2,32,128], index: 8, kind: input, shape index: {}]   ;;  %s5242_s9 = inlined_call_operand.vmem [shape: f32[2,1,128], index: 9, kind: input, shape index: {}]   ;;  %s5243_s10 = inlined_call_operand.vmem [shape: bf16[2,128,32], index: 10, kind: input, shape index: {}]   ;;  %s5244_s11 = inlined_call_operand.vmem [shape: f32[2,1,32], index: 11, kind: input, shape index: {}]   ;;  %s5245_s12 = inlined_call_operand.vmem [shape: bf16[32,128], index: 12, kind: input, shape index: {}]   ;;  %s5246_s13 = inlined_call_operand.vmem [shape: f32[1,128], index: 13, kind: input, shape index: {}]   ;;  %s5247_s14 = inlined_call_operand.vmem [shape: f32[4,8,128], index: 14, kind: output, shape index: {}]  }
   0x1   :  { %5254 = sst [smem:[#allocation9_spill]] %s5233_s0  ;;  %s4225_s15 = smov 0  }
   0x2   :  { %5255 = sst [smem:[#allocation10_spill]] %s5236_s3  ;;  %s4227_s16 = smov 0  }
   0x3   :  { %5256 = sst [smem:[#allocation11_spill]] %s5237_s4  ;;  %s4229_s17 = smov 0  }
   0x4   :  { %5257 = sst [smem:[#allocation12_spill]] %s5239_s6 }
   0x5   :  { %5258 = sst [smem:[#allocation13_spill]] %s5245_s12 }
   0x6   :  { %5259 = sst [smem:[#allocation14_spill]] %s5246_s13 }
   0x7 LB: > { %5260 = sst [smem:[#allocation3_spill]] %s4122_s15  ;;  %s33_s18 = sadd.s32 1, %s4122_s15  ;;  %s4130_s17 = sphi %s4229_s17, %s24_s17   ;;  %s4126_s16 = sphi %s4227_s16, %s5278_s16   ;;  %s4122_s15 = sphi %s4225_s15, %s5277_s15   ;;  %s4118_s30 = sphi %s4223_s30, %s5276_s30   ;;  %s4114_s29 = sphi %s4221_s29, %s5275_s29  }
   0x8   : > { %5261 = sst [smem:[#allocation4_spill]] %s4126_s16  ;;  %s36_s19 = sadd.s32 1, %s4126_s16 }
   0x9   : > { %5262 = sst [smem:[#allocation5_spill]] %s4130_s17  ;;  %p34_p0 = scmp.ge.s32.totalorder %s33_s18, 2 }
   0xa   : > { %p3282_p1 = scmp.ge.s32.totalorder %s4130_s17, 1  ;;  %p496_p2 = scmp.lt.s32.totalorder %s4130_s17, 9 }
   0xb   : > { %s5280_s18 = smov (%p34_p0, %s33_s18), 0  ;;  %s5282_s19 = smov (!%p34_p0, %s36_s19), %s4126_s16 }
   0xc   : > { %5263 = sst [smem:[#allocation6_spill]] %s5280_s18  ;;  %p497_p3 = pnand %p3282_p1, %p496_p2 }
   0xd   : > { %p38_p4 = scmp.ge.s32.totalorder %s5282_s19, 4 }
   0xe   : > { %500 = sbr.rel (%p497_p3) target bundleno = 4585 (0x11e9), region = 76 }
   0xf   : > { %s5284_s19 = smov (%p38_p4, %s5282_s19), 0 }
  0x10   : > { %5264 = sst [smem:[#allocation7_spill]] %s5284_s19 }
  0x15   : > { %p573_p5 = scmp.lt.s32.totalorder %s4118_s30, 3  ;;  %p578_p6 = scmp.lt.s32.totalorder %s4114_s29, 1 }
  0x16   : > { %s5265_s0 = sld [smem:[#allocation9_spill]]  ;;  %s5266_s4 = sld [smem:[#allocation11_spill]] }
  0x17   : > { %s5286_s30 = smov (!%p573_p5, %s4118_s30), 3  ;;  %s5267_s6 = sld [smem:[#allocation12_spill]] }
  0x18   : > { %s4255_s20 = scalar_select %p578_p6, %s4114_s29, 1 }
  0x19   : > { %s3398_s21 = sshll.u32 %s5286_s30, 6  ;;  %s3293_s22 = sshll.u32 %s5286_s30, 3 }
  0x1a   : > { %s3399_s26 = sshll.u32 %s4255_s20, 4  ;;  %s3402_s16 = sshll.u32 %s4255_s20, 6 }
  0x1b   : > { %s609_s13 = scalar_lea.vmem %s5244_s11, %s4255_s20  ;;  %s4303_s23 = scalar_lea.vmem %s5247_s14, %s3293_s22 }
  0x1c   : > { %s4260_s25 = scalar_lea.vmem %s5265_s0, %s3398_s21  ;;  %s4266_s19 = scalar_lea.vmem %s5266_s4, %s3399_s26 }
  0x1d   : > { %s4275_s12 = scalar_lea.vmem %s5267_s6, %s3399_s26  ;;  %s593_s21 = scalar_lea.vmem %s5240_s7, %s4255_s20 }
  0x1e   : > { %5268 = sst [smem:[#allocation8_spill]] %s4275_s12  ;;  %s4284_s0 = scalar_lea.vmem %s5241_s8, %s3399_s26 }
  0x1f   : > { %s601_s4 = scalar_lea.vmem %s5242_s9, %s4255_s20  ;;  %s4298_s12 = scalar_lea.vmem %s5243_s10, %s3402_s16 }
  0x20   : > { %p3294_p7 = scmp.ne.s32.totalorder %s4114_s29, 0 }
  0x21   : > { %v3860_v0 = vld [vmem:[%s5234_s1] sm:$0xff] (!%p3294_p7)   ;;  %v4132_v1 = vmov (!%p3294_p7), 0   ;;  %v3861_v2 = vld [vmem:[%s5234_s1 + $0x8] sm:$0xff] (!%p3294_p7)   ;;  %v3862_v3 = vld [vmem:[%s5234_s1 + $0x10] sm:$0xff] (!%p3294_p7)   ;;  %vm767_vm0 = vcmask (!%p3294_p7), 523264   ;;  %vm845_vm1 = vcmask (!%p3294_p7), 261120  }
  0x22   : > { %618 = sbr.rel (%p3294_p7) target bundleno = 307 (0x133), region = 80  ;;  %780 = vmatprep.subr.bf16.mxu0 (!%p3294_p7), %v4132_v1  ;;  %3738 = vmatprep.subr.bf16.mxu1 (!%p3294_p7), %v4132_v1  ;;  %v3863_v4 = vld [vmem:[%s5234_s1 + $0x18] sm:$0xff] (!%p3294_p7)   ;;  %v3874_v5 = vld [vmem:[%s4260_s25 + $0x4] ss:$8 sps:$4 sm:$0xff] (!%p3294_p7)   ;;  %v3866_v9 = vld [vmem:[%s5234_s1 + $0x30] sm:$0xff] (!%p3294_p7)  }
  0x23   : > { %781 = vmatpush1.bf16.msra.mxu0 (!%p3294_p7), %v3860_v0  ;;  %3750 = vmatpush1.bf16.msra.mxu1 (!%p3294_p7), %v3860_v0  ;;  %v3864_v6 = vld [vmem:[%s5234_s1 + $0x20] sm:$0xff] (!%p3294_p7)   ;;  %v3865_v8 = vld [vmem:[%s5234_s1 + $0x28] sm:$0xff] (!%p3294_p7)   ;;  %v3867_v10 = vld [vmem:[%s5234_s1 + $0x38] sm:$0xff] (!%p3294_p7)  }
  0x24   : > { %782 = vmatprep.subr.bf16.mxu0 (!%p3294_p7), %v4132_v1  ;;  %3739 = vmatprep.subr.bf16.mxu1 (!%p3294_p7), %v4132_v1  ;;  %v3877_v7 = vld [vmem:[%s4260_s25 + $0x24] ss:$8 sps:$4 sm:$0xff] (!%p3294_p7)   ;;  %v3870_v13 = vld [vmem:[%s5234_s1 + $0x50] sm:$0xff] (!%p3294_p7)   ;;  %v3871_v14 = vld [vmem:[%s5234_s1 + $0x58] sm:$0xff] (!%p3294_p7)  }
  0x25   : > { %3315 = vmatprep.mubr.msk.bf16.mxu0 (!%p3294_p7), %vm767_vm0, %v3874_v5  ;;  %3317 = vmatprep.mubr.msk.bf16.mxu1 (!%p3294_p7), %vm767_vm0, %v3877_v7  ;;  %v3868_v11 = vld [vmem:[%s5234_s1 + $0x40] sm:$0xff] (!%p3294_p7)   ;;  %v3869_v12 = vld [vmem:[%s5234_s1 + $0x48] sm:$0xff] (!%p3294_p7)   ;;  %v3878_v17 = vld [vmem:[%s4260_s25 + $0x14] ss:$8 sps:$4 sm:$0xff] (!%p3294_p7)  }
  0x26   : > { %v3872_v15 = vld [vmem:[%s4260_s25] ss:$8 sps:$4 sm:$0xff] (!%p3294_p7)   ;;  %v3880_v18 = vld [vmem:[%s4260_s25 + $0x34] ss:$8 sps:$4 sm:$0xff] (!%p3294_p7)   ;;  %v3882_v19 = vld [vmem:[%s4260_s25 + $0x10] ss:$8 sps:$4 sm:$0xff] (!%p3294_p7)  }
  0x27   : > { %783 = vmatpush1.bf16.msra.mxu0 (!%p3294_p7), %v3861_v2  ;;  %3751 = vmatpush1.bf16.msra.mxu1 (!%p3294_p7), %v3861_v2  ;;  %v3875_v16 = vld [vmem:[%s4260_s25 + $0x20] ss:$8 sps:$4 sm:$0xff] (!%p3294_p7)   ;;  %v3883_v20 = vld [vmem:[%s4260_s25 + $0x30] ss:$8 sps:$4 sm:$0xff] (!%p3294_p7)  }
  0x28   : > { %784 = vmatprep.subr.bf16.mxu0 (!%p3294_p7), %v4132_v1  ;;  %3740 = vmatprep.subr.bf16.mxu1 (!%p3294_p7), %v4132_v1  ;;  %v651_v21 = vld [vmem:[%s5235_s2] sm:$0xff] (!%p3294_p7)  ;;  %v652_v25 = vld [vmem:[%s5235_s2 + $0x8] sm:$0xff] (!%p3294_p7)  ;;  %v653_v37 = vld [vmem:[%s5235_s2 + $0x10] sm:$0xff] (!%p3294_p7) }
  0x29   : > { %v655_v22 = vld [vmem:[%s5235_s2 + $0x20] sm:$0xff]  ;;  %v656_v26 = vld [vmem:[%s5235_s2 + $0x28] sm:$0xff]  ;;  %v657_v38 = vld [vmem:[%s5235_s2 + $0x30] sm:$0xff] }
  0x2a   : > { %v654_v41 = vld [vmem:[%s5235_s2 + $0x18] sm:$0xff] }
  0x2b   : > { %785 = vmatpush1.bf16.msra.mxu0 %v3862_v3  ;;  %3752 = vmatpush1.bf16.msra.mxu1 %v3862_v3  ;;  %v658_v42 = vld [vmem:[%s5235_s2 + $0x38] sm:$0xff] }
  0x2c   : > { %786 = vmatprep.subr.bf16.mxu0 %v4132_v1  ;;  %3741 = vmatprep.subr.bf16.mxu1 %v4132_v1 }
  0x2f   : > { %787 = vmatpush1.bf16.msra.mxu0 %v3863_v4  ;;  %3753 = vmatpush1.bf16.msra.mxu1 %v3863_v4 }
  0x30   : > { %788 = vmatprep.subr.bf16.mxu0 %v4132_v1  ;;  %3742 = vmatprep.subr.bf16.mxu1 %v4132_v1 }
  0x33   : > { %789 = vmatpush1.bf16.msra.mxu0 %v3864_v6  ;;  %3754 = vmatpush1.bf16.msra.mxu1 %v3864_v6 }
  0x34   : > { %790 = vmatprep.subr.bf16.mxu0 %v4132_v1  ;;  %3743 = vmatprep.subr.bf16.mxu1 %v4132_v1 }
  0x37   : > { %791 = vmatpush1.bf16.msra.mxu0 %v3865_v8  ;;  %3755 = vmatpush1.bf16.msra.mxu1 %v3865_v8 }
  0x38   : > { %792 = vmatprep.subr.bf16.mxu0 %v4132_v1  ;;  %3744 = vmatprep.subr.bf16.mxu1 %v4132_v1 }
  0x3b   : > { %793 = vmatpush1.bf16.msra.mxu0 %v3866_v9  ;;  %3756 = vmatpush1.bf16.msra.mxu1 %v3866_v9 }
  0x3c   : > { %794 = vmatprep.subr.bf16.mxu0 %v4132_v1  ;;  %3745 = vmatprep.subr.bf16.mxu1 %v4132_v1 }
  0x3f   : > { %795 = vmatpush1.bf16.msra.mxu0 %v3867_v10  ;;  %3757 = vmatpush1.bf16.msra.mxu1 %v3867_v10 }
  0x40   : > { %796 = vmatprep.subr.bf16.mxu0 %v4132_v1  ;;  %3746 = vmatprep.subr.bf16.mxu1 %v4132_v1 }
  0x43   : > { %797 = vmatpush1.bf16.msra.mxu0 %v3868_v11  ;;  %3758 = vmatpush1.bf16.msra.mxu1 %v3868_v11 }
  0x44   : > { %798 = vmatprep.subr.bf16.mxu0 %v4132_v1  ;;  %3747 = vmatprep.subr.bf16.mxu1 %v4132_v1 }
  0x47   : > { %799 = vmatpush1.bf16.msra.mxu0 %v3869_v12  ;;  %3759 = vmatpush1.bf16.msra.mxu1 %v3869_v12 }
  0x48   : > { %800 = vmatprep.subr.bf16.mxu0 %v4132_v1  ;;  %3748 = vmatprep.subr.bf16.mxu1 %v4132_v1 }
  0x4b   : > { %801 = vmatpush1.bf16.msra.mxu0 %v3870_v13  ;;  %3760 = vmatpush1.bf16.msra.mxu1 %v3870_v13 }
  0x4c   : > { %802 = vmatprep.subr.bf16.mxu0 %v4132_v1  ;;  %3749 = vmatprep.subr.bf16.mxu1 %v4132_v1 }
  0x4f   : > { %803 = vmatpush1.bf16.msra.mxu0 %v3871_v14  ;;  %3761 = vmatpush1.bf16.msra.mxu1 %v3871_v14 }
  0x52   : > { %813 = vmatmul.mubr.bf16.vlgmr.msra.gmra.mrb[0].mxu0 %v3872_v15  ;;  %829 = vmatmul.mubr.bf16.vlgmr.msra.gmra.mrb[0].mxu1 %v3875_v16 }
  0x53   : > { %3316 = vmatprep.mubr.msk.bf16.mxu0 %vm767_vm0, %v3878_v17  ;;  %3318 = vmatprep.mubr.msk.bf16.mxu1 %vm767_vm0, %v3880_v18 }
  0x5a   : > { %821 = vmatmul.mubr.bf16.gmra.mrb[4].mxu0 %v3882_v19  ;;  %837 = vmatmul.mubr.bf16.gmra.mrb[4].mxu1 %v3883_v20 }
 0x125   : > { %v814_v23 = vpop.f32.mrb[0].mxu0  ;;  %v830_v24 = vpop.f32.mrb[0].mxu1 }
 0x126   : > { %v815_v27 = vadd.f32 %v814_v23, %v651_v21  ;;  %v831_v28 = vadd.f32 %v830_v24, %v655_v22  ;;  %v816_v29 = vpop.f32.mrb[1].mxu0  ;;  %v832_v30 = vpop.f32.mrb[1].mxu1 }
 0x127   : > { %v817_v31 = vpop.f32.mrb[2].mxu0  ;;  %v833_v32 = vpop.f32.mrb[2].mxu1 }
 0x128   : > { %846 = vst.msk [vmem:[#allocation2] sm:$0xff] %vm845_vm1, %v815_v27  ;;  %850 = vst.msk [vmem:[#allocation2 + $0x20] sm:$0xff] %vm845_vm1, %v831_v28  ;;  %v818_v33 = vadd.f32 %v817_v31, %v652_v25  ;;  %v834_v34 = vadd.f32 %v833_v32, %v656_v26  ;;  %v819_v35 = vpop.f32.mrb[3].mxu0  ;;  %v835_v36 = vpop.f32.mrb[3].mxu1 }
 0x12a   : > { %847 = vst.msk [vmem:[#allocation2 + $0x8] sm:$0xff] %vm845_vm1, %v818_v33  ;;  %851 = vst.msk [vmem:[#allocation2 + $0x28] sm:$0xff] %vm845_vm1, %v834_v34 }
 0x12d   : > { %v822_v39 = vpop.f32.mrb[4].mxu0  ;;  %v838_v40 = vpop.f32.mrb[4].mxu1 }
 0x12e   : > { %v823_v43 = vadd.f32 %v822_v39, %v653_v37  ;;  %v839_v44 = vadd.f32 %v838_v40, %v657_v38  ;;  %v824_v45 = vpop.f32.mrb[5].mxu0  ;;  %v840_v46 = vpop.f32.mrb[5].mxu1 }
 0x12f   : > { %v825_v47 = vpop.f32.mrb[6].mxu0  ;;  %v841_v48 = vpop.f32.mrb[6].mxu1 }
 0x130   : > { %848 = vst.msk [vmem:[#allocation2 + $0x10] sm:$0xff] %vm845_vm1, %v823_v43  ;;  %852 = vst.msk [vmem:[#allocation2 + $0x30] sm:$0xff] %vm845_vm1, %v839_v44  ;;  %v826_v49 = vadd.f32 %v825_v47, %v654_v41  ;;  %v842_v50 = vadd.f32 %v841_v48, %v658_v42  ;;  %v827_v51 = vpop.f32.mrb[7].mxu0  ;;  %v843_v52 = vpop.f32.mrb[7].mxu1 }
 0x132   : > { %849 = vst.msk [vmem:[#allocation2 + $0x18] sm:$0xff] %vm845_vm1, %v826_v49  ;;  %853 = vst.msk [vmem:[#allocation2 + $0x38] sm:$0xff] %vm845_vm1, %v842_v50 }
 0x133 PF: > { %v854_v53 = vld [vmem:[#allocation2] sm:$0xff]  ;;  %vm870_vm2 = vcmask 261120   ;;  %v855_v55 = vld [vmem:[#allocation2 + $0x8] sm:$0xff]  ;;  %s5269_s22 = scalar_lea.vmem %s5238_s5, %s4255_s20  ;;  %vm1096_vm3 = vcmask 64512   ;;  %s4133_s27 = smov 96   ;;  %vm1186_vm4 = vcmask 523264  }
 0x134   : > { %v871_v56 = vsel %vm870_vm2, %v854_v53, 0.0  ;;  %v858_v59 = vld [vmem:[#allocation2 + $0x20] sm:$0xff]  ;;  %v859_v60 = vld [vmem:[#allocation2 + $0x28] sm:$0xff]  ;;  %v874_v61 = vsel %vm870_vm2, %v855_v55, 0.0  ;;  %s5270_s25 = sld [smem:[#allocation10_spill]]  ;;  %s4135_s3 = smov 88  }
 0x135   : > { %872 = vadd.xlane.f32.xlu0 %v871_v56  ;;  %v883_v63 = vsel %vm870_vm2, %v858_v59, 0.0  ;;  %v886_v0 = vsel %vm870_vm2, %v859_v60, 0.0  ;;  %v3884_v45 = vld [vmem:[%s4266_s19] sm:$0xff]   ;;  %v3885_v46 = vld [vmem:[%s4266_s19 + $0x8] sm:$0xff]   ;;  %s4136_s30 = smov 120   ;;  %s4137_s26 = smov 80  }
 0x136   : > { %3514 = vmatprep.subr.bf16.mxu1 %v3884_v45  ;;  %s4138_s24 = smov 112   ;;  %s4139_s6 = smov 56   ;;  %vm1676_vm5 = vcmask 1043456  }
 0x137   : > { %v856_v54 = vld [vmem:[#allocation2 + $0x10] sm:$0xff]  ;;  %3515 = vmatpush3.bf16.msra.mxu1 %v3884_v45  ;;  %s4140_s19 = smov 72   ;;  %s4141_s15 = smov 104  }
 0x138   : > { %v877_v57 = vsel %vm870_vm2, %v856_v54, 0.0  ;;  %v860_v1 = vld [vmem:[#allocation2 + $0x30] sm:$0xff]  ;;  %3516 = vmatprep.subr.bf16.mxu1 %v3885_v46  ;;  %p3391_p8 = scmp.ne.s32.totalorder %s4114_s29, 1 }
 0x139   : > { %v857_v58 = vld [vmem:[#allocation2 + $0x18] sm:$0xff]  ;;  %878 = vadd.xlane.f32.xlu1 %v877_v57  ;;  %875 = vadd.xlane.f32.xlu0 %v874_v61  ;;  %v889_v3 = vsel %vm870_vm2, %v860_v1, 0.0  ;;  %vm4145_vm6 = vmmov (!%p3391_p8), 0  }
 0x13a   : > { %v880_v62 = vsel %vm870_vm2, %v857_v58, 0.0  ;;  %v861_v2 = vld [vmem:[#allocation2 + $0x38] sm:$0xff] }
 0x13b   : > { %v892_v4 = vsel %vm870_vm2, %v861_v2, 0.0  ;;  %3517 = vmatpush3.bf16.msra.mxu1 %v3885_v46 }
 0x13d   : > { %881 = vadd.xlane.f32.xlu1 %v880_v62  ;;  %884 = vadd.xlane.f32.xlu0 %v883_v63 }
 0x141   : > { %887 = vadd.xlane.f32.xlu1 %v886_v0  ;;  %890 = vadd.xlane.f32.xlu0 %v889_v3 }
 0x145   : > { %893 = vadd.xlane.f32.xlu1 %v892_v4 }
 0x1c2   : > { %v873_v5 = vpop.xlane.xlu0 %872 }
 0x1c3   : > { %v896_v7 = vmul.f32 0.03125, %v873_v5 }
 0x1c5   : > { %v4394_v9 = vsub.f32 %v854_v53, %v896_v7 }
 0x1c6   : > { %v879_v6 = vpop.xlane.xlu1 %878  ;;  %v876_v11 = vpop.xlane.xlu0 %875 }
 0x1c7   : > { %v898_v8 = vmul.f32 0.03125, %v879_v6  ;;  %v897_v13 = vmul.f32 0.03125, %v876_v11  ;;  %v912_v15 = vmul.f32 %v4394_v9, %v4394_v9 }
 0x1c9   : > { %v4396_v10 = vsub.f32 %v856_v54, %v898_v8  ;;  %v4402_v17 = vsub.f32 %v855_v55, %v897_v13  ;;  %v920_v19 = vsel %vm870_vm2, %v912_v15, 0.0 }
 0x1ca   : > { %v882_v12 = vpop.xlane.xlu1 %881  ;;  %921 = vadd.xlane.f32.xlu0 %v920_v19  ;;  %v885_v20 = vpop.xlane.xlu0 %884 }
 0x1cb   : > { %v899_v14 = vmul.f32 0.03125, %v882_v12  ;;  %v914_v16 = vmul.f32 %v4396_v10, %v4396_v10  ;;  %v900_v23 = vmul.f32 0.03125, %v885_v20  ;;  %v913_v25 = vmul.f32 %v4402_v17, %v4402_v17 }
 0x1cd   : > { %v4404_v18 = vsub.f32 %v857_v58, %v899_v14  ;;  %v926_v22 = vsel %vm870_vm2, %v914_v16, 0.0  ;;  %v4412_v27 = vsub.f32 %v858_v59, %v900_v23  ;;  %v923_v29 = vsel %vm870_vm2, %v913_v25, 0.0 }
 0x1ce   : > { %v888_v21 = vpop.xlane.xlu1 %887  ;;  %927 = vadd.xlane.f32.xlu0 %v926_v22  ;;  %924 = vadd.xlane.f32.xlu1 %v923_v29  ;;  %v891_v30 = vpop.xlane.xlu0 %890 }
 0x1cf   : > { %v901_v24 = vmul.f32 0.03125, %v888_v21  ;;  %v915_v26 = vmul.f32 %v4404_v18, %v4404_v18  ;;  %v902_v33 = vmul.f32 0.03125, %v891_v30  ;;  %v916_v35 = vmul.f32 %v4412_v27, %v4412_v27 }
 0x1d1   : > { %v4414_v28 = vsub.f32 %v859_v60, %v901_v24  ;;  %v929_v32 = vsel %vm870_vm2, %v915_v26, 0.0  ;;  %v4422_v37 = vsub.f32 %v860_v1, %v902_v33  ;;  %v932_v39 = vsel %vm870_vm2, %v916_v35, 0.0 }
 0x1d2   : > { %v894_v31 = vpop.xlane.xlu1 %893  ;;  %930 = vadd.xlane.f32.xlu1 %v929_v32  ;;  %933 = vadd.xlane.f32.xlu0 %v932_v39 }
 0x1d3   : > { %v903_v34 = vmul.f32 0.03125, %v894_v31  ;;  %v917_v36 = vmul.f32 %v4414_v28, %v4414_v28  ;;  %v918_v41 = vmul.f32 %v4422_v37, %v4422_v37 }
 0x1d5   : > { %v4424_v38 = vsub.f32 %v861_v2, %v903_v34  ;;  %v935_v40 = vsel %vm870_vm2, %v917_v36, 0.0  ;;  %v938_v43 = vsel %vm870_vm2, %v918_v41, 0.0 }
 0x1d6   : > { %936 = vadd.xlane.f32.xlu1 %v935_v40  ;;  %939 = vadd.xlane.f32.xlu0 %v938_v43 }
 0x1d7   : > { %v919_v42 = vmul.f32 %v4424_v38, %v4424_v38 }
 0x1d9   : > { %v941_v44 = vsel %vm870_vm2, %v919_v42, 0.0 }
 0x1da   : > { %942 = vadd.xlane.f32.xlu1 %v941_v44 }
 0x257   : > { %v922_v47 = vpop.xlane.xlu0 %921 }
 0x258   : > { %v944_v48 = vmul.f32 0.03125, %v922_v47 }
 0x25a   : > { %v952_v49 = vadd.f32 1e-06, %v944_v48 }
 0x25b   : > { %v925_v50 = vpop.xlane.xlu1 %924  ;;  %v928_v51 = vpop.xlane.xlu0 %927 }
 0x25c   : > { %v945_v52 = vmul.f32 0.03125, %v925_v50  ;;  %v946_v53 = vmul.f32 0.03125, %v928_v51  ;;  %3896 = vrsqrt.f32 %v952_v49 }
 0x25e   : > { %v953_v54 = vadd.f32 1e-06, %v945_v52  ;;  %v954_v55 = vadd.f32 1e-06, %v946_v53 }
 0x25f   : > { %v931_v56 = vpop.xlane.xlu1 %930  ;;  %v934_v57 = vpop.xlane.xlu0 %933 }
 0x260   : > { %3898 = vrsqrt.f32 %v953_v54  ;;  %v947_v58 = vmul.f32 0.03125, %v931_v56  ;;  %v948_v59 = vmul.f32 0.03125, %v934_v57  ;;  %v4484_v56 = vld [vmem:[%s5270_s25 + $0x10] sm:$0xff] }
 0x261   : > { %3900 = vrsqrt.f32 %v954_v55 }
 0x262   : > { %v955_v60 = vadd.f32 1e-06, %v947_v58  ;;  %v956_v61 = vadd.f32 1e-06, %v948_v59  ;;  %v4489_v58 = vld [vmem:[%s5270_s25] sm:$0xff] }
 0x263   : > { %v937_v62 = vpop.xlane.xlu1 %936  ;;  %v940_v63 = vpop.xlane.xlu0 %939 }
 0x264   : > { %3902 = vrsqrt.f32 %v955_v60  ;;  %v949_v0 = vmul.f32 0.03125, %v937_v62  ;;  %v950_v1 = vmul.f32 0.03125, %v940_v63 }
 0x265   : > { %3904 = vrsqrt.f32 %v956_v61  ;;  %v4495_v61 = vld [vmem:[%s5270_s25 + $0x8] sm:$0xff] }
 0x266   : > { %v957_v2 = vadd.f32 1e-06, %v949_v0  ;;  %v958_v3 = vadd.f32 1e-06, %v950_v1  ;;  %v3897_v5 = vpop.eup %3896 }
 0x267   : > { %v943_v4 = vpop.xlane.xlu1 %942  ;;  %v968_v11 = vmul.f32 %v3897_v5, %v4394_v9 }
 0x268   : > { %3906 = vrsqrt.f32 %v957_v2  ;;  %v951_v6 = vmul.f32 0.03125, %v943_v4  ;;  %v4502_v2 = vld [vmem:[%s5270_s25 + $0x18] sm:$0xff] }
 0x269   : > { %3908 = vrsqrt.f32 %v958_v3 }
 0x26a   : > { %v3899_v7 = vpop.eup %3898  ;;  %v959_v8 = vadd.f32 1e-06, %v951_v6 }
 0x26b   : > { %v969_v12 = vmul.f32 %v3899_v7, %v4402_v17  ;;  %v3901_v13 = vpop.eup %3900  ;;  %v4511_v7 = vld [vmem:[%s5270_s25 + $0x30] sm:$0xff] }
 0x26c   : > { %3910 = vrsqrt.f32 %v959_v8  ;;  %v970_v16 = vmul.f32 %v3901_v13, %v4396_v10 }
 0x26d   : > { %v976_v14 = vpack.c.bf16 %v969_v12, %v968_v11 }
 0x26e   : > { %v3903_v15 = vpop.eup %3902 }
 0x26f   : > { %3518 = vmatprep.mubr.msk.bf16.mxu1 %vm870_vm2, %v976_v14  ;;  %v971_v19 = vmul.f32 %v3903_v15, %v4404_v18  ;;  %v3905_v20 = vpop.eup %3904 }
 0x270   : > { %v972_v9 = vmul.f32 %v3905_v20, %v4412_v27  ;;  %v3319_v27 = vld [vmem:[%s5269_s22] ss:$0 sm:$0xff]  ;;  %s5271_s22 = sld [smem:[#allocation8_spill]] }
 0x271   : > { %v977_v21 = vpack.c.bf16 %v971_v19, %v970_v16  ;;  %v4518_v16 = vld [vmem:[%s5270_s25 + $0x20] sm:$0xff] }
 0x272   : > { %v3907_v22 = vpop.eup %3906 }
 0x273   : > { %3519 = vmatmul.mubr.msk.bf16.vlgmr.msra.gmra.mrb[0].mxu1 %vm870_vm2, %v977_v21  ;;  %v973_v17 = vmul.f32 %v3907_v22, %v4414_v28  ;;  %v3909_v23 = vpop.eup %3908  ;;  %v4529_v22 = vld [vmem:[%s5270_s25 + $0x38] sm:$0xff] }
 0x274   : > { %v974_v26 = vmul.f32 %v3909_v23, %v4422_v37 }
 0x275   : > { %v978_v24 = vpack.c.bf16 %v973_v17, %v972_v9  ;;  %v4537_v17 = vld [vmem:[%s5270_s25 + $0x28] sm:$0xff] }
 0x276   : > { %v3911_v25 = vpop.eup %3910 }
 0x277   : > { %3522 = vmatprep.mubr.msk.bf16.mxu1 %vm870_vm2, %v978_v24  ;;  %v975_v10 = vmul.f32 %v3911_v25, %v4424_v38 }
 0x279   : > { %v979_v18 = vpack.c.bf16 %v975_v10, %v974_v26 }
 0x27b   : > { %3523 = vmatmul.mubr.msk.bf16.gmra.mrb[4].mxu1 %vm870_vm2, %v979_v18 }
 0x346   : > { %v3520_v29 = vpop.f32.mrb[0].mxu1 }
 0x347   : > { %v1049_v30 = vpop.f32.mrb[1].mxu1  ;;  %v1058_v31 = vadd.f32 %v3520_v29, %v3319_v27 }
 0x348   : > { %v3521_v28 = vpop.f32.mrb[2].mxu1  ;;  %v1050_v34 = vadd.f32 %v3319_v27, %v1049_v30 }
 0x349   : > { %v1061_v32 = vadd.f32 %v3521_v28, %v3319_v27  ;;  %v1052_v33 = vpop.f32.mrb[3].mxu1 }
 0x34a   : > { %v1053_v35 = vadd.f32 %v3319_v27, %v1052_v33 }
 0x34b   : > { %v4453_v36 = vpack.c.bf16 %v1061_v32, %v1058_v31 }
 0x34c   : > { %v4455_v37 = vpack.c.bf16 %v1053_v35, %v1050_v34 }
 0x34d   : > { %1090 = vrot.lane.b32.xlu1 %v4453_v36, %s4133_s27 }
 0x34e   : > { %1088 = vrot.lane.b32.xlu0 %v4455_v37, %s4133_s27  ;;  %v3524_v38 = vpop.f32.mrb[4].mxu1  ;;  %3534 = vmatprep.mubr.msk.bf16.mxu1 %vm1096_vm3, %v4455_v37 }
 0x34f   : > { %v1065_v39 = vpop.f32.mrb[5].mxu1  ;;  %v1074_v41 = vadd.f32 %v3524_v38, %v3319_v27 }
 0x350   : > { %v3525_v40 = vpop.f32.mrb[6].mxu1  ;;  %v1066_v44 = vadd.f32 %v3319_v27, %v1065_v39 }
 0x351   : > { %v1077_v42 = vadd.f32 %v3525_v40, %v3319_v27  ;;  %v1068_v43 = vpop.f32.mrb[7].mxu1 }
 0x352   : > { %v1069_v45 = vadd.f32 %v3319_v27, %v1068_v43 }
 0x353   : > { %v4461_v46 = vpack.c.bf16 %v1077_v42, %v1074_v41 }
 0x354   : > { %v4463_v47 = vpack.c.bf16 %v1069_v45, %v1066_v44 }
 0x356   : > { %1092 = vrot.lane.b32.xlu1 %v4463_v47, %s4133_s27 }
 0x35a   : > { %1094 = vrot.lane.b32.xlu1 %v4461_v46, %s4133_s27  ;;  %s4134_s27 = smov 64  }
 0x3bf   : > { %v1091_v50 = vpop.permute.xlu1 %1090 }
 0x3c0   : > { %v1089_v48 = vpop.permute.xlu0 %1088  ;;  %v1113_v51 = vsel %vm1096_vm3, %v1091_v50, 0 }
 0x3c1   : > { %3786 = vmatprep.subr.msk.bf16.mxu1 %vm1096_vm3, %v1089_v48  ;;  %v1110_v49 = vsel %vm1096_vm3, %v1089_v48, 0 }
 0x3c2   : > { %3527 = vmatpush3.bf16.xpose.msra.mxu1 %v1110_v49 }
 0x3c3   : > { %3787 = vmatprep.subr.msk.bf16.mxu1 %vm1096_vm3, %v1091_v50 }
 0x3c8   : > { %v1093_v52 = vpop.permute.xlu1 %1092 }
 0x3c9   : > { %v1116_v53 = vsel %vm1096_vm3, %v1093_v52, 0 }
 0x3ca   : > { %3529 = vmatpush3.bf16.xpose.msra.mxu1 %v1113_v51 }
 0x3cb   : > { %3788 = vmatprep.subr.msk.bf16.mxu1 %vm1096_vm3, %v1093_v52 }
 0x3cc   : > { %v1095_v54 = vpop.permute.xlu1 %1094 }
 0x3cd   : > { %v1119_v55 = vsel %vm1096_vm3, %v1095_v54, 0 }
 0x3d2   : > { %3531 = vmatpush3.bf16.xpose.msra.mxu1 %v1116_v53 }
 0x3d3   : > { %3789 = vmatprep.subr.msk.bf16.mxu1 %vm1096_vm3, %v1095_v54 }
 0x3da   : > { %3533 = vmatpush3.bf16.xpose.msra.mxu1 %v1119_v55 }
 0x3e1   : > { %3535 = vmatmul.mubr.msk.bf16.vlgmr.msra.gmra.mrb[8].mxu1 %vm1096_vm3, %v4453_v36 }
 0x3e2   : > { %3538 = vmatprep.mubr.msk.bf16.mxu1 %vm1096_vm3, %v4463_v47 }
 0x3e9   : > { %3539 = vmatmul.mubr.msk.bf16.gmra.mrb[12].mxu1 %vm1096_vm3, %v4461_v46 }
 0x4b4   : > { %v3536_v57 = vpop.f32.mrb[8].mxu1 }
 0x4b5   : > { %v1164_v59 = vadd.f32 %v3536_v57, %v4484_v56  ;;  %v1155_v60 = vpop.f32.mrb[9].mxu1 }
 0x4b6   : > { %v3537_v62 = vpop.f32.mrb[10].mxu1  ;;  %v1156_v63 = vadd.f32 %v1155_v60, %v4489_v58 }
 0x4b7   : > { %v1158_v0 = vpop.f32.mrb[11].mxu1  ;;  %v1193_v1 = vsel %vm1186_vm4, %v1164_v59, -inf  ;;  %v1167_v5 = vadd.f32 %v3537_v62, %v4502_v2 }
 0x4b8   : > { %v1159_v3 = vadd.f32 %v1158_v0, %v4495_v61  ;;  %1194 = vmax.xlane.f32.xlu0 %v1193_v1  ;;  %v1187_v6 = vsel %vm1186_vm4, %v1156_v63, -inf }
 0x4b9   : > { %v1196_v15 = vsel %vm1186_vm4, %v1167_v5, -inf }
 0x4ba   : > { %v1190_v4 = vsel %vm1186_vm4, %v1159_v3, -inf }
 0x4bb   : > { %1191 = vmax.xlane.f32.xlu1 %v1190_v4 }
 0x4bc   : > { %v3540_v8 = vpop.f32.mrb[12].mxu1  ;;  %1188 = vmax.xlane.f32.xlu0 %v1187_v6 }
 0x4bd   : > { %v1171_v11 = vpop.f32.mrb[13].mxu1  ;;  %v1180_v13 = vadd.f32 %v3540_v8, %v4511_v7 }
 0x4be   : > { %v3541_v12 = vpop.f32.mrb[14].mxu1  ;;  %v1172_v19 = vadd.f32 %v1171_v11, %v4518_v16 }
 0x4bf   : > { %v1174_v14 = vpop.f32.mrb[15].mxu1  ;;  %v1205_v20 = vsel %vm1186_vm4, %v1180_v13, -inf  ;;  %v4532_v9 = vadd.f32 %v3541_v12, %v4529_v22 }
 0x4c0   : > { %1197 = vmax.xlane.f32.xlu0 %v1196_v15  ;;  %v1199_v21 = vsel %vm1186_vm4, %v1172_v19, -inf  ;;  %v4540_v23 = vadd.f32 %v1174_v14, %v4537_v17 }
 0x4c1   : > { %v1208_v24 = vsel %vm1186_vm4, %v4532_v9, -inf }
 0x4c2   : > { %v1202_v25 = vsel %vm1186_vm4, %v4540_v23, -inf }
 0x4c4   : > { %1206 = vmax.xlane.f32.xlu0 %v1205_v20 }
 0x4c8   : > { %1200 = vmax.xlane.f32.xlu0 %v1199_v21 }
 0x4cc   : > { %1281 = vrot.lane.b32.xlu1 %v4453_v36, %s4134_s27 }
 0x4d0   : > { %1283 = vrot.lane.b32.xlu1 %v4463_v47, %s4134_s27 }
 0x4de   : > { %1279 = vrot.lane.b32.xlu0 %v4455_v37, %s4134_s27 }
 0x4f4   : > { %1209 = vmax.xlane.f32.xlu1 %v1208_v24 }
 0x4f8   : > { %1203 = vmax.xlane.f32.xlu1 %v1202_v25 }
 0x509   : > { %1285 = vrot.lane.b32.xlu1 %v4461_v46, %s4134_s27  ;;  %s4142_s27 = smov 48  }
 0x545   : > { %v1195_v26 = vpop.xlane.xlu0 %1194 }
 0x546   : > { %v1213_v10 = vsub.f32 %v1164_v59, %v1195_v26 }
 0x548   : > { %v1223_v18 = vmul.f32 1.442695, %v1213_v10  ;;  %v1192_v29 = vpop.xlane.xlu1 %1191 }
 0x549   : > { %v1189_v27 = vpop.xlane.xlu0 %1188  ;;  %v1212_v28 = vsub.f32 %v1159_v3, %v1192_v29 }
 0x54a   : > { %3912 = vpow2.f32 %v1223_v18  ;;  %v1211_v30 = vsub.f32 %v1156_v63, %v1189_v27 }
 0x54b   : > { %v1221_v34 = vmul.f32 1.442695, %v1212_v28 }
 0x54c   : > { %v1219_v31 = vmul.f32 1.442695, %v1211_v30  ;;  %v1282_v49 = vpop.permute.xlu1 %1281 }
 0x54d   : > { %v1198_v32 = vpop.xlane.xlu0 %1197 }
 0x54e   : > { %3914 = vpow2.f32 %v1219_v31  ;;  %v1214_v33 = vsub.f32 %v1167_v5, %v1198_v32 }
 0x550   : > { %v1225_v35 = vmul.f32 1.442695, %v1214_v33  ;;  %v1284_v55 = vpop.permute.xlu1 %1283 }
 0x551   : > { %v1207_v38 = vpop.xlane.xlu0 %1206 }
 0x552   : > { %3916 = vpow2.f32 %v1225_v35  ;;  %v1217_v39 = vsub.f32 %v1180_v13, %v1207_v38 }
 0x553   : > { %3918 = vpow2.f32 %v1221_v34 }
 0x554   : > { %v4547_v40 = vpop.eup %3912  ;;  %v1231_v41 = vmul.f32 1.442695, %v1217_v39 }
 0x555   : > { %v1201_v42 = vpop.xlane.xlu0 %1200  ;;  %v1241_v43 = vsel %vm1186_vm4, %v4547_v40, 0.0 }
 0x556   : > { %3920 = vpow2.f32 %v1231_v41  ;;  %v1215_v44 = vsub.f32 %v1172_v19, %v1201_v42  ;;  %1242 = vadd.xlane.f32.xlu0 %v1241_v43 }
 0x558   : > { %v4551_v45 = vpop.eup %3914  ;;  %v1227_v48 = vmul.f32 1.442695, %v1215_v44 }
 0x559   : > { %v1280_v50 = vpop.permute.xlu0 %1279  ;;  %v1235_v51 = vsel %vm1186_vm4, %v4551_v45, 0.0 }
 0x55a   : > { %3922 = vpow2.f32 %v1227_v48  ;;  %1236 = vadd.xlane.f32.xlu0 %v1235_v51  ;;  %3542 = vmatprep.subr.bf16.mxu0 %v1280_v50 }
 0x55b   : > { %3543 = vmatpush3.bf16.msra.mxu0 %v1280_v50 }
 0x55c   : > { %v4555_v52 = vpop.eup %3916  ;;  %3544 = vmatprep.subr.bf16.mxu0 %v1282_v49 }
 0x55d   : > { %v1244_v53 = vsel %vm1186_vm4, %v4555_v52, 0.0  ;;  %v4559_v54 = vpop.eup %3918 }
 0x55e   : > { %1245 = vadd.xlane.f32.xlu1 %v1244_v53  ;;  %v1238_v59 = vsel %vm1186_vm4, %v4559_v54, 0.0 }
 0x55f   : > { %3545 = vmatpush3.bf16.msra.mxu0 %v1282_v49 }
 0x560   : > { %v4561_v57 = vpop.eup %3920  ;;  %3546 = vmatprep.subr.bf16.mxu0 %v1284_v55 }
 0x561   : > { %v1253_v60 = vsel %vm1186_vm4, %v4561_v57, 0.0 }
 0x562   : > { %1239 = vadd.xlane.f32.xlu1 %v1238_v59  ;;  %1254 = vadd.xlane.f32.xlu0 %v1253_v60 }
 0x563   : > { %3547 = vmatpush3.bf16.msra.mxu0 %v1284_v55 }
 0x564   : > { %v4567_v62 = vpop.eup %3922 }
 0x565   : > { %v1247_v63 = vsel %vm1186_vm4, %v4567_v62, 0.0 }
 0x566   : > { %1248 = vadd.xlane.f32.xlu0 %v1247_v63 }
 0x573   : > { %1383 = vrot.lane.b32.xlu1 %v4453_v36, %s4135_s3 }
 0x577   : > { %1385 = vrot.lane.b32.xlu1 %v4463_v47, %s4135_s3 }
 0x581   : > { %v1210_v0 = vpop.xlane.xlu1 %1209 }
 0x582   : > { %v1218_v1 = vsub.f32 %v4532_v9, %v1210_v0 }
 0x584   : > { %v1233_v3 = vmul.f32 1.442695, %v1218_v1 }
 0x585   : > { %v1204_v4 = vpop.xlane.xlu1 %1203 }
 0x586   : > { %3924 = vpow2.f32 %v1233_v3  ;;  %v1216_v5 = vsub.f32 %v4540_v23, %v1204_v4 }
 0x588   : > { %v1229_v6 = vmul.f32 1.442695, %v1216_v5 }
 0x589   : > { %v1286_v8 = vpop.permute.xlu1 %1285 }
 0x58a   : > { %3548 = vmatprep.subr.bf16.mxu0 %v1286_v8  ;;  %3926 = vpow2.f32 %v1229_v6 }
 0x58b   : > { %3549 = vmatpush3.bf16.msra.mxu0 %v1286_v8 }
 0x590   : > { %v4575_v11 = vpop.eup %3924 }
 0x591   : > { %v1256_v12 = vsel %vm1186_vm4, %v4575_v11, 0.0 }
 0x592   : > { %1257 = vadd.xlane.f32.xlu0 %v1256_v12 }
 0x594   : > { %v4579_v13 = vpop.eup %3926 }
 0x595   : > { %v1250_v14 = vsel %vm1186_vm4, %v4579_v13, 0.0 }
 0x59b   : > { %1251 = vadd.xlane.f32.xlu1 %v1250_v14 }
 0x5a8   : > { %1381 = vrot.lane.b32.xlu0 %v4455_v37, %s4135_s3 }
 0x5ac   : > { %1387 = vrot.lane.b32.xlu1 %v4461_v46, %s4135_s3  ;;  %1373 = vrot.lane.b32.xlu0 %v4455_v37, %s4136_s30  ;;  %s4143_s3 = smov 40  }
 0x5b0   : > { %1375 = vrot.lane.b32.xlu1 %v4453_v36, %s4136_s30  ;;  %1377 = vrot.lane.b32.xlu0 %v4463_v47, %s4136_s30 }
 0x5b4   : > { %1379 = vrot.lane.b32.xlu1 %v4461_v46, %s4136_s30  ;;  %1833 = vrot.lane.b32.xlu0 %v4455_v37, %s4137_s26 }
 0x5b8   : > { %1835 = vrot.lane.b32.xlu1 %v4453_v36, %s4137_s26  ;;  %1837 = vrot.lane.b32.xlu0 %v4463_v47, %s4137_s26 }
 0x5bc   : > { %1839 = vrot.lane.b32.xlu1 %v4461_v46, %s4137_s26  ;;  %1825 = vrot.lane.b32.xlu0 %v4455_v37, %s4138_s24  ;;  %s5272_s26 = sld [smem:[#allocation13_spill]] (!%p3391_p8) }
 0x5c0   : > { %1827 = vrot.lane.b32.xlu1 %v4453_v36, %s4138_s24  ;;  %1829 = vrot.lane.b32.xlu0 %v4463_v47, %s4138_s24 }
 0x5c4   : > { %1831 = vrot.lane.b32.xlu1 %v4461_v46, %s4138_s24 }
 0x5e3   : > { %v1243_v15 = vpop.xlane.xlu0 %1242 }
 0x5e7   : > { %v1237_v19 = vpop.xlane.xlu0 %1236 }
 0x5eb   : > { %v1246_v20 = vpop.xlane.xlu1 %1245 }
 0x5ec   : > { %3928 = vrcp.f32 %v1246_v20 }
 0x5ed   : > { %3930 = vrcp.f32 %v1237_v19 }
 0x5ee   : > { %3932 = vrcp.f32 %v1243_v15 }
 0x5ef   : > { %v1240_v21 = vpop.xlane.xlu1 %1239  ;;  %v1255_v28 = vpop.xlane.xlu0 %1254 }
 0x5f0   : > { %3934 = vrcp.f32 %v1240_v21 }
 0x5f3   : > { %v1249_v31 = vpop.xlane.xlu0 %1248  ;;  %v1384_v32 = vpop.permute.xlu1 %1383 }
 0x5f6   : > { %v3929_v9 = vpop.eup %3928 }
 0x5f7   : > { %v3931_v23 = vpop.eup %3930  ;;  %v1270_v26 = vmul.f32 %v3929_v9, %v4555_v52  ;;  %v1386_v35 = vpop.permute.xlu1 %1385 }
 0x5f8   : > { %v3933_v24 = vpop.eup %3932  ;;  %v1267_v10 = vmul.f32 %v3931_v23, %v4551_v45  ;;  %v1408_v50 = vsel %vm1096_vm3, %v1386_v35, 0 }
 0x5f9   : > { %v1269_v29 = vmul.f32 %v3933_v24, %v4547_v40  ;;  %v1405_v40 = vsel %vm1096_vm3, %v1384_v32, 0 }
 0x5fa   : > { %v3935_v25 = vpop.eup %3934 }
 0x5fb   : > { %v1268_v18 = vmul.f32 %v3935_v25, %v4559_v54  ;;  %v1276_v30 = vpack.c.bf16 %v1270_v26, %v1269_v29 }
 0x5fd   : > { %v1275_v27 = vpack.c.bf16 %v1268_v18, %v1267_v10 }
 0x5ff   : > { %3550 = vmatprep.mubr.msk.bf16.mxu0 %vm1186_vm4, %v1275_v27 }
 0x600   : > { %3551 = vmatmul.mubr.msk.bf16.vlgmr.msra.gmra.mrb[0].mxu0 %vm1186_vm4, %v1276_v30 }
 0x61f   : > { %v1258_v33 = vpop.xlane.xlu0 %1257 }
 0x620   : > { %3936 = vrcp.f32 %v1258_v33 }
 0x621   : > { %3938 = vrcp.f32 %v1249_v31 }
 0x622   : > { %3940 = vrcp.f32 %v1255_v28 }
 0x623   : > { %v1382_v34 = vpop.permute.xlu0 %1381 }
 0x624   : > { %3790 = vmatprep.subr.msk.bf16.mxu0 %vm1096_vm3, %v1382_v34  ;;  %v1402_v38 = vsel %vm1096_vm3, %v1382_v34, 0 }
 0x625   : > { %3559 = vmatpush3.bf16.xpose.msra.mxu0 %v1402_v38 }
 0x626   : > { %3791 = vmatprep.subr.msk.bf16.mxu0 %vm1096_vm3, %v1384_v32 }
 0x627   : > { %v1374_v43 = vpop.permute.xlu0 %1373 }
 0x628   : > { %v1252_v39 = vpop.xlane.xlu1 %1251 }
 0x629   : > { %3942 = vrcp.f32 %v1252_v39 }
 0x62a   : > { %v3937_v41 = vpop.eup %3936 }
 0x62b   : > { %v3939_v42 = vpop.eup %3938  ;;  %v1274_v49 = vmul.f32 %v3937_v41, %v4575_v11  ;;  %v1378_v55 = vpop.permute.xlu0 %1377 }
 0x62c   : > { %v3941_v44 = vpop.eup %3940  ;;  %v1388_v48 = vpop.permute.xlu1 %1387  ;;  %v1271_v51 = vmul.f32 %v3939_v42, %v4567_v62 }
 0x62d   : > { %3561 = vmatpush3.bf16.xpose.msra.mxu0 %v1405_v40  ;;  %v1273_v53 = vmul.f32 %v3941_v44, %v4561_v57  ;;  %v1411_v63 = vsel %vm1096_vm3, %v1388_v48, 0 }
 0x62e   : > { %3792 = vmatprep.subr.msk.bf16.mxu0 %vm1096_vm3, %v1386_v35 }
 0x62f   : > { %v1278_v59 = vpack.c.bf16 %v1274_v49, %v1273_v53  ;;  %v1834_v62 = vpop.permute.xlu0 %1833 }
 0x630   : > { %v1376_v60 = vpop.permute.xlu1 %1375  ;;  %v1854_v57 = vsel %vm1096_vm3, %v1834_v62, 0 }
 0x633   : > { %v3943_v45 = vpop.eup %3942  ;;  %v1838_v3 = vpop.permute.xlu0 %1837 }
 0x634   : > { %v1272_v52 = vmul.f32 %v3943_v45, %v4579_v13  ;;  %v1380_v0 = vpop.permute.xlu1 %1379  ;;  %v1860_v6 = vsel %vm1096_vm3, %v1838_v3, 0 }
 0x635   : > { %3563 = vmatpush3.bf16.xpose.msra.mxu0 %v1408_v50 }
 0x636   : > { %3793 = vmatprep.subr.msk.bf16.mxu0 %vm1096_vm3, %v1388_v48  ;;  %v1277_v54 = vpack.c.bf16 %v1272_v52, %v1271_v51 }
 0x637   : > { %v1826_v4 = vpop.permute.xlu0 %1825 }
 0x638   : > { %3554 = vmatprep.mubr.msk.bf16.mxu0 %vm1186_vm4, %v1277_v54  ;;  %v1836_v1 = vpop.permute.xlu1 %1835 }
 0x639   : > { %3555 = vmatmul.mubr.msk.bf16.gmra.mrb[4].mxu0 %vm1186_vm4, %v1278_v59  ;;  %v1857_v5 = vsel %vm1096_vm3, %v1836_v1, 0 }
 0x63a   : > { %3566 = vmatprep.mubr.msk.bf16.mxu0 %vm1096_vm3, %v1374_v43 }
 0x63b   : > { %v1830_v13 = vpop.permute.xlu0 %1829 }
 0x63c   : > { %v1840_v8 = vpop.permute.xlu1 %1839 }
 0x63d   : > { %3565 = vmatpush3.bf16.xpose.msra.mxu0 %v1411_v63  ;;  %v1863_v11 = vsel %vm1096_vm3, %v1840_v8, 0 }
 0x63e   : > { %3796 = vmatprep.subr.msk.bf16.mxu0 %vm1096_vm3, %v1834_v62 }
 0x640   : > { %v1828_v12 = vpop.permute.xlu1 %1827 }
 0x644   : > { %3567 = vmatmul.mubr.msk.bf16.vlgmr.msra.gmra.mrb[8].mxu0 %vm1096_vm3, %v1376_v60  ;;  %v1832_v14 = vpop.permute.xlu1 %1831 }
 0x645   : > { %3570 = vmatprep.mubr.msk.bf16.mxu0 %vm1096_vm3, %v1378_v55  ;;  %3611 = vmatpush3.bf16.xpose.msra.mxu0 %v1854_v57 }
 0x646   : > { %3797 = vmatprep.subr.msk.bf16.mxu0 %vm1096_vm3, %v1836_v1 }
 0x64c   : > { %3571 = vmatmul.mubr.msk.bf16.gmra.mrb[12].mxu0 %vm1096_vm3, %v1380_v0 }
 0x64d   : > { %3613 = vmatpush3.bf16.xpose.msra.mxu0 %v1857_v5  ;;  %3618 = vmatprep.mubr.msk.bf16.mxu0 %vm1096_vm3, %v1826_v4 }
 0x64e   : > { %3798 = vmatprep.subr.msk.bf16.mxu0 %vm1096_vm3, %v1838_v3 }
 0x655   : > { %3615 = vmatpush3.bf16.xpose.msra.mxu0 %v1860_v6 }
 0x656   : > { %3799 = vmatprep.subr.msk.bf16.mxu0 %vm1096_vm3, %v1840_v8 }
 0x65d   : > { %3617 = vmatpush3.bf16.xpose.msra.mxu0 %v1863_v11 }
 0x664   : > { %3619 = vmatmul.mubr.msk.bf16.vlgmr.msra.gmra.mrb[16].mxu0 %vm1096_vm3, %v1828_v12 }
 0x665   : > { %3622 = vmatprep.mubr.msk.bf16.mxu0 %vm1096_vm3, %v1830_v13 }
 0x66c   : > { %3623 = vmatmul.mubr.msk.bf16.gmra.mrb[20].mxu0 %vm1096_vm3, %v1832_v14 }
 0x6d3   : > { %v4633_v15 = vpop.f32.mrb[0].mxu0 }
 0x6d4   : > { %v4635_v19 = vpop.f32.mrb[1].mxu0 }
 0x6d5   : > { %v4637_v20 = vpop.f32.mrb[2].mxu0 }
 0x6d6   : > { %v1369_v21 = vpack.c.bf16 %v4637_v20, %v4633_v15  ;;  %v4641_v9 = vpop.f32.mrb[3].mxu0 }
 0x6d7   : > { %v1368_v23 = vpack.c.bf16 %v4641_v9, %v4635_v19  ;;  %v4072_v19 = vld [vmem:[%s5270_s25] sm:$0xff] }
 0x70c   : > { %v4645_v24 = vpop.f32.mrb[4].mxu0 }
 0x70d   : > { %v4647_v25 = vpop.f32.mrb[5].mxu0 }
 0x70e   : > { %v4649_v26 = vpop.f32.mrb[6].mxu0 }
 0x70f   : > { %v1371_v10 = vpack.c.bf16 %v4649_v26, %v4645_v24  ;;  %v4653_v18 = vpop.f32.mrb[7].mxu0  ;;  %v4076_v26 = vld [vmem:[%s5270_s25 + $0x20] sm:$0xff] }
 0x710   : > { %v1370_v29 = vpack.c.bf16 %v4653_v18, %v4647_v25  ;;  %v4073_v25 = vld [vmem:[%s5270_s25 + $0x10] sm:$0xff] }
 0x717   : > { %v3568_v27 = vpop.f32.mrb[8].mxu0 }
 0x718   : > { %v1447_v30 = vpop.f32.mrb[9].mxu0  ;;  %v1456_v33 = vadd.f32 %v3568_v27, %v4484_v56 }
 0x719   : > { %v1448_v28 = vadd.f32 %v1447_v30, %v4489_v58  ;;  %v3569_v31 = vpop.f32.mrb[10].mxu0 }
 0x71a   : > { %v1450_v32 = vpop.f32.mrb[11].mxu0  ;;  %v1459_v39 = vadd.f32 %v3569_v31, %v4502_v2  ;;  %v1484_v41 = vsel %vm1186_vm4, %v1456_v33, -inf }
 0x71b   : > { %v1451_v34 = vadd.f32 %v1450_v32, %v4495_v61  ;;  %v1478_v35 = vsel %vm1186_vm4, %v1448_v28, -inf }
 0x71c   : > { %1479 = vmax.xlane.f32.xlu0 %v1478_v35  ;;  %v1487_v49 = vsel %vm1186_vm4, %v1459_v39, -inf }
 0x71d   : > { %v1481_v38 = vsel %vm1186_vm4, %v1451_v34, -inf }
 0x71e   : > { %1482 = vmax.xlane.f32.xlu1 %v1481_v38 }
 0x71f   : > { %v3572_v40 = vpop.f32.mrb[12].mxu0 }
 0x720   : > { %1485 = vmax.xlane.f32.xlu0 %v1484_v41  ;;  %v1463_v42 = vpop.f32.mrb[13].mxu0  ;;  %v1472_v52 = vadd.f32 %v3572_v40, %v4511_v7 }
 0x721   : > { %v3573_v43 = vpop.f32.mrb[14].mxu0  ;;  %v1464_v45 = vadd.f32 %v1463_v42, %v4518_v16 }
 0x722   : > { %v1466_v44 = vpop.f32.mrb[15].mxu0  ;;  %v4670_v50 = vadd.f32 %v3573_v43, %v4529_v22  ;;  %v1496_v55 = vsel %vm1186_vm4, %v1472_v52, -inf }
 0x723   : > { %v4666_v48 = vadd.f32 %v1466_v44, %v4537_v17  ;;  %v1490_v53 = vsel %vm1186_vm4, %v1464_v45, -inf }
 0x724   : > { %1488 = vmax.xlane.f32.xlu0 %v1487_v49  ;;  %v1499_v54 = vsel %vm1186_vm4, %v4670_v50, -inf }
 0x725   : > { %v1493_v51 = vsel %vm1186_vm4, %v4666_v48, -inf }
 0x726   : > { %1494 = vmax.xlane.f32.xlu1 %v1493_v51 }
 0x728   : > { %1491 = vmax.xlane.f32.xlu0 %v1490_v53 }
 0x72a   : > { %1500 = vmax.xlane.f32.xlu1 %v1499_v54 }
 0x72c   : > { %1497 = vmax.xlane.f32.xlu0 %v1496_v55 }
 0x737   : > { %v4679_v59 = vpop.f32.mrb[16].mxu0 }
 0x738   : > { %v4681_v60 = vpop.f32.mrb[17].mxu0 }
 0x739   : > { %v4683_v63 = vpop.f32.mrb[18].mxu0 }
 0x73a   : > { %v4685_v62 = vpop.f32.mrb[19].mxu0 }
 0x73f   : > { %v4687_v0 = vpop.f32.mrb[20].mxu0 }
 0x740   : > { %v4689_v57 = vpop.f32.mrb[21].mxu0 }
 0x741   : > { %v4691_v1 = vpop.f32.mrb[22].mxu0 }
 0x742   : > { %v4693_v3 = vpop.f32.mrb[23].mxu0 }
 0x7a9   : > { %v1480_v4 = vpop.xlane.xlu0 %1479 }
 0x7aa   : > { %v1502_v5 = vsub.f32 %v1448_v28, %v1480_v4 }
 0x7ab   : > { %v1483_v6 = vpop.xlane.xlu1 %1482 }
 0x7ac   : > { %v1510_v12 = vmul.f32 1.442695, %v1502_v5  ;;  %v1503_v13 = vsub.f32 %v1451_v34, %v1483_v6 }
 0x7ad   : > { %v1486_v8 = vpop.xlane.xlu0 %1485 }
 0x7ae   : > { %v1504_v11 = vsub.f32 %v1456_v33, %v1486_v8  ;;  %v1512_v31 = vmul.f32 1.442695, %v1503_v13 }
 0x7b0   : > { %v1514_v14 = vmul.f32 1.442695, %v1504_v11 }
 0x7b1   : > { %v1489_v27 = vpop.xlane.xlu0 %1488 }
 0x7b2   : > { %3944 = vpow2.f32 %v1514_v14  ;;  %v1505_v30 = vsub.f32 %v1459_v39, %v1489_v27  ;;  %v4740_v27 = vadd.f32 %v4681_v60, %v4489_v58  ;;  %v4777_v60 = vadd.f32 %v4685_v62, %v4495_v61 }
 0x7b3   : > { %3946 = vpow2.f32 %v1510_v12  ;;  %v1495_v4 = vpop.xlane.xlu1 %1494 }
 0x7b4   : > { %v1516_v32 = vmul.f32 1.442695, %v1505_v30  ;;  %v1507_v8 = vsub.f32 %v4666_v48, %v1495_v4  ;;  %v4744_v30 = vadd.f32 %v4679_v59, %v4484_v56  ;;  %v4758_v56 = vadd.f32 %v4689_v57, %v4518_v16 }
 0x7b5   : > { %v1492_v35 = vpop.xlane.xlu0 %1491 }
 0x7b6   : > { %3948 = vpow2.f32 %v1516_v32  ;;  %v1506_v38 = vsub.f32 %v1464_v45, %v1492_v35  ;;  %v1520_v12 = vmul.f32 1.442695, %v1507_v8  ;;  %v4751_v32 = vadd.f32 %v4683_v63, %v4502_v2 }
 0x7b7   : > { %3950 = vpow2.f32 %v1512_v31  ;;  %v1501_v5 = vpop.xlane.xlu1 %1500  ;;  %v1930_v31 = vsel %vm1186_vm4, %v4740_v27, -inf  ;;  %v1936_v35 = vsel %vm1186_vm4, %v4744_v30, -inf  ;;  %v4765_v2 = vadd.f32 %v4687_v0, %v4511_v7 }
 0x7b8   : > { %v1518_v28 = vmul.f32 1.442695, %v1506_v38  ;;  %v1509_v6 = vsub.f32 %v4670_v50, %v1501_v5  ;;  %v1939_v58 = vsel %vm1186_vm4, %v4751_v32, -inf  ;;  %v1942_v59 = vsel %vm1186_vm4, %v4758_v56, -inf }
 0x7b9   : > { %v1498_v40 = vpop.xlane.xlu0 %1497  ;;  %v1948_v16 = vsel %vm1186_vm4, %v4765_v2, -inf  ;;  %v4781_v7 = vadd.f32 %v4693_v3, %v4537_v17  ;;  %v1933_v63 = vsel %vm1186_vm4, %v4777_v60, -inf  ;;  %v4787_v0 = vadd.f32 %v4691_v1, %v4529_v22 }
 0x7ba   : > { %v1508_v41 = vsub.f32 %v1472_v52, %v1498_v40  ;;  %v1524_v11 = vmul.f32 1.442695, %v1509_v6 }
 0x7bb   : > { %v1945_v38 = vsel %vm1186_vm4, %v4781_v7, -inf  ;;  %v1951_v62 = vsel %vm1186_vm4, %v4787_v0, -inf }
 0x7bc   : > { %v4695_v42 = vpop.eup %3944  ;;  %v1522_v43 = vmul.f32 1.442695, %v1508_v41 }
 0x7bd   : > { %v1532_v33 = vsel %vm1186_vm4, %v4695_v42, 0.0  ;;  %v4699_v34 = vpop.eup %3946 }
 0x7be   : > { %3952 = vpow2.f32 %v1522_v43  ;;  %1533 = vadd.xlane.f32.xlu0 %v1532_v33  ;;  %v1526_v44 = vsel %vm1186_vm4, %v4699_v34, 0.0 }
 0x7bf   : > { %3954 = vpow2.f32 %v1518_v28 }
 0x7c0   : > { %v4701_v39 = vpop.eup %3948  ;;  %3956 = vpow2.f32 %v1524_v11 }
 0x7c1   : > { %v1535_v45 = vsel %vm1186_vm4, %v4701_v39, 0.0  ;;  %v4707_v49 = vpop.eup %3950  ;;  %3958 = vpow2.f32 %v1520_v12 }
 0x7c2   : > { %1527 = vadd.xlane.f32.xlu0 %v1526_v44  ;;  %1536 = vadd.xlane.f32.xlu1 %v1535_v45  ;;  %v1529_v51 = vsel %vm1186_vm4, %v4707_v49, 0.0 }
 0x7c6   : > { %1530 = vadd.xlane.f32.xlu1 %v1529_v51 }
 0x7c8   : > { %v4711_v52 = vpop.eup %3952 }
 0x7c9   : > { %v1544_v53 = vsel %vm1186_vm4, %v4711_v52, 0.0  ;;  %v4715_v54 = vpop.eup %3954 }
 0x7ca   : > { %1545 = vadd.xlane.f32.xlu0 %v1544_v53  ;;  %v1538_v55 = vsel %vm1186_vm4, %v4715_v54, 0.0  ;;  %v4730_v13 = vpop.eup %3956 }
 0x7cb   : > { %v1547_v50 = vsel %vm1186_vm4, %v4730_v13, 0.0  ;;  %v4734_v14 = vpop.eup %3958 }
 0x7cc   : > { %v1541_v48 = vsel %vm1186_vm4, %v4734_v14, 0.0 }
 0x7ce   : > { %1539 = vadd.xlane.f32.xlu0 %v1538_v55 }
 0x7d7   : > { %1572 = vrot.lane.b32.xlu1 %v4453_v36, %s4139_s6 }
 0x7db   : > { %1574 = vrot.lane.b32.xlu1 %v4463_v47, %s4139_s6 }
 0x7e4   : > { %1570 = vrot.lane.b32.xlu0 %v4455_v37, %s4139_s6 }
 0x7e8   : > { %2212 = vrot.lane.b32.xlu0 %v4455_v37, %s4140_s19 }
 0x7ec   : > { %2216 = vrot.lane.b32.xlu0 %v4463_v47, %s4140_s19 }
 0x7f0   : > { %2204 = vrot.lane.b32.xlu0 %v4455_v37, %s4141_s15 }
 0x7f4   : > { %2208 = vrot.lane.b32.xlu0 %v4463_v47, %s4141_s15 }
 0x7ff   : > { %1548 = vadd.xlane.f32.xlu1 %v1547_v50 }
 0x803   : > { %1542 = vadd.xlane.f32.xlu1 %v1541_v48 }
 0x813   : > { %1931 = vmax.xlane.f32.xlu0 %v1930_v31 }
 0x814   : > { %1576 = vrot.lane.b32.xlu1 %v4461_v46, %s4139_s6 }
 0x817   : > { %1937 = vmax.xlane.f32.xlu0 %v1936_v35 }
 0x818   : > { %2214 = vrot.lane.b32.xlu1 %v4453_v36, %s4140_s19 }
 0x81b   : > { %1940 = vmax.xlane.f32.xlu0 %v1939_v58 }
 0x81c   : > { %2218 = vrot.lane.b32.xlu1 %v4461_v46, %s4140_s19 }
 0x81f   : > { %1943 = vmax.xlane.f32.xlu0 %v1942_v59 }
 0x820   : > { %2206 = vrot.lane.b32.xlu1 %v4453_v36, %s4141_s15 }
 0x823   : > { %1949 = vmax.xlane.f32.xlu0 %v1948_v16 }
 0x824   : > { %2210 = vrot.lane.b32.xlu1 %v4461_v46, %s4141_s15  ;;  %s5273_s15 = sld [smem:[#allocation14_spill]] (!%p3391_p8) }
 0x848   : > { %1934 = vmax.xlane.f32.xlu1 %v1933_v63 }
 0x84b   : > { %v1534_v57 = vpop.xlane.xlu0 %1533 }
 0x84c   : > { %1946 = vmax.xlane.f32.xlu1 %v1945_v38 }
 0x84f   : > { %v1537_v40 = vpop.xlane.xlu1 %1536  ;;  %v1528_v61 = vpop.xlane.xlu0 %1527 }
 0x850   : > { %1952 = vmax.xlane.f32.xlu1 %v1951_v62  ;;  %3960 = vrcp.f32 %v1528_v61 }
 0x853   : > { %v1531_v17 = vpop.xlane.xlu1 %1530 }
 0x854   : > { %3962 = vrcp.f32 %v1531_v17 }
 0x855   : > { %3964 = vrcp.f32 %v1537_v40 }
 0x856   : > { %3966 = vrcp.f32 %v1534_v57 }
 0x857   : > { %v1546_v3 = vpop.xlane.xlu0 %1545  ;;  %v1573_v22 = vpop.permute.xlu1 %1572 }
 0x85a   : > { %v3961_v28 = vpop.eup %3960 }
 0x85b   : > { %v1540_v41 = vpop.xlane.xlu0 %1539  ;;  %v1558_v33 = vmul.f32 %v3961_v28, %v4699_v34  ;;  %v1575_v55 = vpop.permute.xlu1 %1574 }
 0x85e   : > { %v3963_v43 = vpop.eup %3962 }
 0x85f   : > { %v1571_v1 = vpop.permute.xlu0 %1570  ;;  %v1559_v44 = vmul.f32 %v3963_v43, %v4707_v49  ;;  %v3965_v5 = vpop.eup %3964 }
 0x860   : > { %3574 = vmatprep.subr.bf16.mxu1 %v1571_v1  ;;  %v3967_v8 = vpop.eup %3966  ;;  %v1561_v11 = vmul.f32 %v3965_v5, %v4701_v39 }
 0x861   : > { %3575 = vmatpush3.bf16.msra.mxu1 %v1571_v1  ;;  %v1566_v45 = vpack.c.bf16 %v1559_v44, %v1558_v33  ;;  %v1560_v50 = vmul.f32 %v3967_v8, %v4695_v42 }
 0x862   : > { %3576 = vmatprep.subr.bf16.mxu1 %v1573_v22 }
 0x863   : > { %3582 = vmatprep.mubr.msk.bf16.mxu1 %vm1186_vm4, %v1566_v45  ;;  %v2213_v51 = vpop.permute.xlu0 %2212  ;;  %v1567_v48 = vpack.c.bf16 %v1561_v11, %v1560_v50 }
 0x864   : > { %v2233_v53 = vsel %vm1096_vm3, %v2213_v51, 0  ;;  %3801 = vmatprep.subr.msk.bf16.mxu0 %vm1096_vm3, %v2213_v51 }
 0x865   : > { %3577 = vmatpush3.bf16.msra.mxu1 %v1573_v22  ;;  %3653 = vmatpush3.bf16.xpose.msra.mxu0 %v2233_v53 }
 0x866   : > { %3578 = vmatprep.subr.bf16.mxu1 %v1575_v55 }
 0x867   : > { %v2217_v4 = vpop.permute.xlu0 %2216 }
 0x869   : > { %3579 = vmatpush3.bf16.msra.mxu1 %v1575_v55 }
 0x86b   : > { %v2205_v34 = vpop.permute.xlu0 %2204 }
 0x86c   : > { %3660 = vmatprep.mubr.msk.bf16.mxu0 %vm1096_vm3, %v2205_v34 }
 0x86f   : > { %v2209_v42 = vpop.permute.xlu0 %2208 }
 0x88c   : > { %v1549_v49 = vpop.xlane.xlu1 %1548 }
 0x88d   : > { %3968 = vrcp.f32 %v1549_v49 }
 0x88e   : > { %3970 = vrcp.f32 %v1540_v41 }
 0x88f   : > { %3972 = vrcp.f32 %v1546_v3  ;;  %v2239_v3 = vsel %vm1096_vm3, %v2217_v4, 0 }
 0x890   : > { %v1543_v6 = vpop.xlane.xlu1 %1542 }
 0x891   : > { %3974 = vrcp.f32 %v1543_v6 }
 0x894   : > { %v1577_v12 = vpop.permute.xlu1 %1576 }
 0x895   : > { %3580 = vmatprep.subr.bf16.mxu1 %v1577_v12 }
 0x896   : > { %3581 = vmatpush3.bf16.msra.mxu1 %v1577_v12 }
 0x897   : > { %v3969_v31 = vpop.eup %3968 }
 0x898   : > { %v2215_v35 = vpop.permute.xlu1 %2214  ;;  %v3971_v58 = vpop.eup %3970  ;;  %v1565_v39 = vmul.f32 %v3969_v31, %v4730_v13 }
 0x899   : > { %v2236_v59 = vsel %vm1096_vm3, %v2215_v35, 0  ;;  %3583 = vmatmul.mubr.msk.bf16.vlgmr.msra.gmra.mrb[16].mxu1 %vm1186_vm4, %v1567_v48  ;;  %3802 = vmatprep.subr.msk.bf16.mxu0 %vm1096_vm3, %v2215_v35  ;;  %v3973_v16 = vpop.eup %3972  ;;  %v1562_v57 = vmul.f32 %v3971_v58, %v4715_v54 }
 0x89a   : > { %3655 = vmatpush3.bf16.xpose.msra.mxu0 %v2236_v59  ;;  %v1564_v40 = vmul.f32 %v3973_v16, %v4711_v52  ;;  %v1663_v59 = vld [vmem:[%s5271_s22 + $0x4] sm:$0xf] }
 0x89b   : > { %v3975_v63 = vpop.eup %3974  ;;  %3803 = vmatprep.subr.msk.bf16.mxu0 %vm1096_vm3, %v2217_v4  ;;  %3794 = vmatprep.subr.msk.bf16.mxu1 %vm1676_vm5, %v1663_v59  ;;  %v1678_v16 = vsel %vm1676_vm5, %v1663_v59, 0  ;;  %v4075_v59 = vld [vmem:[%s5270_s25 + $0x18] sm:$0xff] }
 0x89c   : > { %v1563_v38 = vmul.f32 %v3975_v63, %v4734_v14  ;;  %v1569_v62 = vpack.c.bf16 %v1565_v39, %v1564_v40  ;;  %v2219_v41 = vpop.permute.xlu1 %2218  ;;  %3591 = vmatpush3.bf16.msra.mxu1 %v1678_v16  ;;  %v1372_v63 = vld [vmem:[%s5271_s22] sm:$0xf] }
 0x89d   : > { %v2242_v22 = vsel %vm1096_vm3, %v2219_v41, 0  ;;  %3795 = vmatprep.subr.msk.bf16.mxu1 %vm1676_vm5, %v1372_v63 }
 0x89e   : > { %v1568_v61 = vpack.c.bf16 %v1563_v38, %v1562_v57 }
 0x8a0   : > { %3586 = vmatprep.mubr.msk.bf16.mxu1 %vm1186_vm4, %v1568_v61  ;;  %v1932_v17 = vpop.xlane.xlu0 %1931  ;;  %v2207_v45 = vpop.permute.xlu1 %2206 }
 0x8a1   : > { %3587 = vmatmul.mubr.msk.bf16.gmra.mrb[20].mxu1 %vm1186_vm4, %v1569_v62  ;;  %v1954_v13 = vsub.f32 %v4740_v27, %v1932_v17 }
 0x8a2   : > { %3657 = vmatpush3.bf16.xpose.msra.mxu0 %v2239_v3 }
 0x8a3   : > { %3804 = vmatprep.subr.msk.bf16.mxu0 %vm1096_vm3, %v2219_v41  ;;  %v1962_v28 = vmul.f32 1.442695, %v1954_v13 }
 0x8a4   : > { %v1938_v54 = vpop.xlane.xlu0 %1937  ;;  %v2211_v49 = vpop.permute.xlu1 %2210 }
 0x8a5   : > { %v1956_v14 = vsub.f32 %v4744_v30, %v1938_v54 }
 0x8a7   : > { %v1966_v52 = vmul.f32 1.442695, %v1956_v14 }
 0x8a8   : > { %v1941_v43 = vpop.xlane.xlu0 %1940 }
 0x8a9   : > { %3976 = vpow2.f32 %v1966_v52  ;;  %v1957_v1 = vsub.f32 %v4751_v32, %v1941_v43 }
 0x8aa   : > { %3659 = vmatpush3.bf16.xpose.msra.mxu0 %v2242_v22  ;;  %3978 = vpow2.f32 %v1962_v28 }
 0x8ab   : > { %v1968_v33 = vmul.f32 1.442695, %v1957_v1  ;;  %v1758_v1 = vsel %vm1676_vm5, %v1372_v63, 0 }
 0x8ac   : > { %v1944_v44 = vpop.xlane.xlu0 %1943 }
 0x8ad   : > { %3980 = vpow2.f32 %v1968_v33  ;;  %v1958_v27 = vsub.f32 %v4758_v56, %v1944_v44 }
 0x8af   : > { %v1970_v55 = vmul.f32 1.442695, %v1958_v27 }
 0x8b0   : > { %v1950_v51 = vpop.xlane.xlu0 %1949 }
 0x8b1   : > { %v1960_v53 = vsub.f32 %v4765_v2, %v1950_v51  ;;  %3661 = vmatmul.mubr.msk.bf16.vlgmr.msra.gmra.mrb[24].mxu0 %vm1096_vm3, %v2207_v45 }
 0x8b2   : > { %3664 = vmatprep.mubr.msk.bf16.mxu0 %vm1096_vm3, %v2209_v42 }
 0x8b3   : > { %v4821_v30 = vpop.eup %3976  ;;  %v1974_v4 = vmul.f32 1.442695, %v1960_v53 }
 0x8b4   : > { %v1984_v32 = vsel %vm1186_vm4, %v4821_v30, 0.0  ;;  %v4825_v34 = vpop.eup %3978 }
 0x8b5   : > { %3982 = vpow2.f32 %v1974_v4  ;;  %1985 = vadd.xlane.f32.xlu0 %v1984_v32  ;;  %v1978_v2 = vsel %vm1186_vm4, %v4825_v34, 0.0 }
 0x8b6   : > { %3984 = vpow2.f32 %v1970_v55 }
 0x8b7   : > { %v4827_v56 = vpop.eup %3980 }
 0x8b8   : > { %v1987_v5 = vsel %vm1186_vm4, %v4827_v56, 0.0 }
 0x8b9   : > { %3665 = vmatmul.mubr.msk.bf16.gmra.mrb[28].mxu0 %vm1096_vm3, %v2211_v49  ;;  %1979 = vadd.xlane.f32.xlu0 %v1978_v2 }
 0x8ba   : > { %1988 = vadd.xlane.f32.xlu1 %v1987_v5 }
 0x8bf   : > { %v4834_v6 = vpop.eup %3982 }
 0x8c0   : > { %v1996_v8 = vsel %vm1186_vm4, %v4834_v6, 0.0  ;;  %v4838_v11 = vpop.eup %3984 }
 0x8c1   : > { %1997 = vadd.xlane.f32.xlu0 %v1996_v8  ;;  %v1990_v12 = vsel %vm1186_vm4, %v4838_v11, 0.0 }
 0x8c5   : > { %1991 = vadd.xlane.f32.xlu0 %v1990_v12 }
 0x8d5   : > { %v1935_v50 = vpop.xlane.xlu1 %1934 }
 0x8d6   : > { %v1955_v48 = vsub.f32 %v4777_v60, %v1935_v50 }
 0x8d8   : > { %v1964_v31 = vmul.f32 1.442695, %v1955_v48 }
 0x8d9   : > { %v1947_v60 = vpop.xlane.xlu1 %1946 }
 0x8da   : > { %3986 = vpow2.f32 %v1964_v31  ;;  %v1959_v57 = vsub.f32 %v4781_v7, %v1947_v60 }
 0x8db   : > { %2022 = vrot.lane.b32.xlu0 %v4455_v37, %s4142_s27 }
 0x8dc   : > { %v1972_v40 = vmul.f32 1.442695, %v1959_v57 }
 0x8dd   : > { %v1953_v39 = vpop.xlane.xlu1 %1952 }
 0x8de   : > { %v1961_v42 = vsub.f32 %v4787_v0, %v1953_v39 }
 0x8e0   : > { %v1976_v38 = vmul.f32 1.442695, %v1961_v42  ;;  %v4077_v42 = vld [vmem:[%s5270_s25 + $0x28] sm:$0xff] }
 0x8e2   : > { %3988 = vpow2.f32 %v1976_v38 }
 0x8e3   : > { %3990 = vpow2.f32 %v1972_v40  ;;  %v4078_v40 = vld [vmem:[%s5270_s25 + $0x38] sm:$0xff] }
 0x8e4   : > { %v4844_v35 = vpop.eup %3986 }
 0x8e5   : > { %v1981_v58 = vsel %vm1186_vm4, %v4844_v35, 0.0 }
 0x8e6   : > { %1982 = vadd.xlane.f32.xlu1 %v1981_v58 }
 0x8ec   : > { %v4857_v61 = vpop.eup %3988 }
 0x8ed   : > { %v1999_v62 = vsel %vm1186_vm4, %v4857_v61, 0.0  ;;  %v4861_v17 = vpop.eup %3990 }
 0x8ee   : > { %v1993_v3 = vsel %vm1186_vm4, %v4861_v17, 0.0 }
 0x8f7   : > { %2024 = vrot.lane.b32.xlu1 %v4453_v36, %s4142_s27 }
 0x8fb   : > { %2026 = vrot.lane.b32.xlu1 %v4463_v47, %s4142_s27 }
 0x91f   : > { %2000 = vadd.xlane.f32.xlu1 %v1999_v62 }
 0x923   : > { %1994 = vadd.xlane.f32.xlu1 %v1993_v3 }
 0x934   : > { %2028 = vrot.lane.b32.xlu1 %v4461_v46, %s4142_s27 }
 0x942   : > { %v4866_v0 = vpop.xlane.xlu0 %1985 }
 0x946   : > { %v1980_v7 = vpop.xlane.xlu0 %1979 }
 0x947   : > { %v4873_v33 = vpop.xlane.xlu1 %1988 }
 0x94e   : > { %v4868_v41 = vpop.xlane.xlu0 %1997 }
 0x952   : > { %v4870_v14 = vpop.xlane.xlu0 %1991 }
 0x956   : > { %v2023_v44 = vpop.permute.xlu0 %2022 }
 0x96c   : > { %v3584_v13 = vpop.f32.mrb[16].mxu1 }
 0x96d   : > { %v1628_v54 = vpop.f32.mrb[17].mxu1 }
 0x96e   : > { %v3585_v28 = vpop.f32.mrb[18].mxu1 }
 0x96f   : > { %v1660_v52 = vpack.c.bf16 %v3585_v28, %v3584_v13  ;;  %v1631_v43 = vpop.f32.mrb[19].mxu1 }
 0x970   : > { %v1659_v22 = vpack.c.bf16 %v1631_v43, %v1628_v54 }
 0x972   : > { %3592 = vmatprep.mubr.msk.bf16.mxu1 %vm1096_vm3, %v1659_v22 }
 0x973   : > { %3593 = vmatmul.mubr.msk.bf16.vlgmr.msra.gmra.mrb[24].mxu1 %vm1096_vm3, %v1660_v52  ;;  %v1983_v51 = vpop.xlane.xlu1 %1982 }
 0x974   : > { %3601 = vmatpush3.bf16.msra.mxu1 %v1758_v1  ;;  %v3588_v27 = vpop.f32.mrb[20].mxu1  ;;  %3992 = vrcp.f32 %v1983_v51 }
 0x975   : > { %3626 = vmatprep.subr.bf16.mxu1 %v2023_v44  ;;  %v1644_v45 = vpop.f32.mrb[21].mxu1  ;;  %3994 = vrcp.f32 %v1980_v7  ;;  %v4079_v7 = vld [vmem:[%s5270_s25 + $0x30] sm:$0xff] }
 0x976   : > { %v3589_v53 = vpop.f32.mrb[22].mxu1  ;;  %3996 = vrcp.f32 %v4873_v33 }
 0x977   : > { %v1662_v55 = vpack.c.bf16 %v3589_v53, %v3588_v27  ;;  %v1647_v4 = vpop.f32.mrb[23].mxu1  ;;  %v2025_v49 = vpop.permute.xlu1 %2024  ;;  %3998 = vrcp.f32 %v4866_v0 }
 0x978   : > { %v1661_v32 = vpack.c.bf16 %v1647_v4, %v1644_v45 }
 0x97a   : > { %3596 = vmatprep.mubr.msk.bf16.mxu1 %vm1096_vm3, %v1661_v32 }
 0x97b   : > { %3597 = vmatmul.mubr.msk.bf16.gmra.mrb[28].mxu1 %vm1096_vm3, %v1662_v55 }
 0x97c   : > { %3602 = vmatprep.mubr.msk.bf16.mxu1 %vm1096_vm3, %v1368_v23 }
 0x97e   : > { %v3993_v2 = vpop.eup %3992 }
 0x97f   : > { %v3995_v8 = vpop.eup %3994  ;;  %v2011_v15 = vmul.f32 %v3993_v2, %v4844_v35  ;;  %v2115_v2 = vld [vmem:[%s5271_s22 + $0x8] sm:$0xf] }
 0x980   : > { %v2010_v31 = vmul.f32 %v3995_v8, %v4825_v34  ;;  %v3997_v22 = vpop.eup %3996 }
 0x981   : > { %v2013_v27 = vmul.f32 %v3997_v22, %v4827_v56 }
 0x982   : > { %v2018_v58 = vpack.c.bf16 %v2011_v15, %v2010_v31 }
 0x983   : > { %3603 = vmatmul.mubr.msk.bf16.vlgmr.msra.gmra.mrb[24].mxu1 %vm1096_vm3, %v1369_v21  ;;  %v2027_v21 = vpop.permute.xlu1 %2026 }
 0x984   : > { %3627 = vmatpush3.bf16.msra.mxu1 %v2023_v44  ;;  %3606 = vmatprep.mubr.msk.bf16.mxu1 %vm1096_vm3, %v1370_v29  ;;  %v3662_v5 = vpop.f32.mrb[24].mxu0  ;;  %v4074_v29 = vld [vmem:[%s5270_s25 + $0x8] sm:$0xff]  ;;  %v3999_v44 = vpop.eup %3998 }
 0x985   : > { %3628 = vmatprep.subr.bf16.mxu1 %v2025_v49  ;;  %v2278_v12 = vpop.f32.mrb[25].mxu0  ;;  %v4900_v18 = vadd.f32 %v4073_v25, %v3662_v5  ;;  %v2012_v51 = vmul.f32 %v3999_v44, %v4821_v30  ;;  %v2129_v5 = vsel %vm1676_vm5, %v2115_v2, 0 }
 0x986   : > { %v4894_v9 = vadd.f32 %v4072_v19, %v2278_v12  ;;  %v3663_v23 = vpop.f32.mrb[26].mxu0 }
 0x987   : > { %v2281_v20 = vpop.f32.mrb[27].mxu0  ;;  %v4919_v16 = vadd.f32 %v4075_v59, %v3663_v23  ;;  %v2315_v63 = vsel %vm1186_vm4, %v4900_v18, -inf  ;;  %v2019_v33 = vpack.c.bf16 %v2013_v27, %v2012_v51 }
 0x988   : > { %3629 = vmatpush3.bf16.msra.mxu1 %v2025_v49  ;;  %v4905_v50 = vadd.f32 %v4074_v29, %v2281_v20  ;;  %v2309_v48 = vsel %vm1186_vm4, %v4894_v9, -inf }
 0x989   : > { %3630 = vmatprep.subr.bf16.mxu1 %v2027_v21  ;;  %2310 = vmax.xlane.f32.xlu0 %v2309_v48  ;;  %v2318_v38 = vsel %vm1186_vm4, %v4919_v16, -inf }
 0x98a   : > { %v2312_v35 = vsel %vm1186_vm4, %v4905_v50, -inf }
 0x98b   : > { %3607 = vmatmul.mubr.msk.bf16.gmra.mrb[28].mxu1 %vm1096_vm3, %v1371_v10  ;;  %2313 = vmax.xlane.f32.xlu1 %v2312_v35 }
 0x98c   : > { %3631 = vmatpush3.bf16.msra.mxu1 %v2027_v21  ;;  %3634 = vmatprep.mubr.msk.bf16.mxu1 %vm1186_vm4, %v2018_v58  ;;  %v3666_v34 = vpop.f32.mrb[28].mxu0 }
 0x98d   : > { %v2294_v60 = vpop.f32.mrb[29].mxu0  ;;  %2316 = vmax.xlane.f32.xlu0 %v2315_v63  ;;  %v2303_v13 = vadd.f32 %v4079_v7, %v3666_v34 }
 0x98e   : > { %v3667_v39 = vpop.f32.mrb[30].mxu0  ;;  %v4927_v10 = vadd.f32 %v4076_v26, %v2294_v60 }
 0x98f   : > { %v2297_v24 = vpop.f32.mrb[31].mxu0  ;;  %v4939_v62 = vadd.f32 %v4078_v40, %v3667_v39  ;;  %v2327_v52 = vsel %vm1186_vm4, %v2303_v13, -inf }
 0x990   : > { %v4932_v57 = vadd.f32 %v4077_v42, %v2297_v24  ;;  %v2321_v54 = vsel %vm1186_vm4, %v4927_v10, -inf }
 0x991   : > { %2319 = vmax.xlane.f32.xlu0 %v2318_v38  ;;  %v2330_v28 = vsel %vm1186_vm4, %v4939_v62, -inf }
 0x992   : > { %v2324_v3 = vsel %vm1186_vm4, %v4932_v57, -inf }
 0x993   : > { %2325 = vmax.xlane.f32.xlu1 %v2324_v3 }
 0x995   : > { %2322 = vmax.xlane.f32.xlu0 %v2321_v54 }
 0x997   : > { %2331 = vmax.xlane.f32.xlu1 %v2330_v28 }
 0x999   : > { %2328 = vmax.xlane.f32.xlu0 %v2327_v52 }
 0x9ac   : > { %v2001_v43 = vpop.xlane.xlu1 %2000 }
 0x9ad   : > { %4000 = vrcp.f32 %v2001_v43 }
 0x9ae   : > { %4002 = vrcp.f32 %v4870_v14 }
 0x9af   : > { %4004 = vrcp.f32 %v4868_v41 }
 0x9b0   : > { %v1995_v1 = vpop.xlane.xlu1 %1994 }
 0x9b1   : > { %4006 = vrcp.f32 %v1995_v1 }
 0x9b4   : > { %v2029_v45 = vpop.permute.xlu1 %2028 }
 0x9b5   : > { %3632 = vmatprep.subr.bf16.mxu1 %v2029_v45 }
 0x9b6   : > { %3633 = vmatpush3.bf16.msra.mxu1 %v2029_v45 }
 0x9b7   : > { %v4001_v0 = vpop.eup %4000  ;;  %3800 = vmatprep.subr.msk.bf16.mxu1 %vm1676_vm5, %v2115_v2 }
 0x9b8   : > { %v4003_v53 = vpop.eup %4002  ;;  %v2017_v41 = vmul.f32 %v4001_v0, %v4857_v61 }
 0x9b9   : > { %3635 = vmatmul.mubr.msk.bf16.vlgmr.msra.gmra.mrb[32].mxu1 %vm1186_vm4, %v2019_v33  ;;  %v4005_v14 = vpop.eup %4004  ;;  %v2014_v4 = vmul.f32 %v4003_v53, %v4838_v11 }
 0x9ba   : > { %v2016_v56 = vmul.f32 %v4005_v14, %v4834_v6  ;;  %3643 = vmatpush3.bf16.msra.mxu1 %v2129_v5 }
 0x9bb   : > { %v4007_v55 = vpop.eup %4006 }
 0x9bc   : > { %v2015_v32 = vmul.f32 %v4007_v55, %v4861_v17  ;;  %v2021_v30 = vpack.c.bf16 %v2017_v41, %v2016_v56 }
 0x9be   : > { %v2020_v49 = vpack.c.bf16 %v2015_v32, %v2014_v4 }
 0x9c0   : > { %3638 = vmatprep.mubr.msk.bf16.mxu1 %vm1186_vm4, %v2020_v49 }
 0x9c1   : > { %3639 = vmatmul.mubr.msk.bf16.gmra.mrb[36].mxu1 %vm1186_vm4, %v2021_v30 }
 0xa16   : > { %v2311_v8 = vpop.xlane.xlu0 %2310 }
 0xa17   : > { %v2333_v61 = vsub.f32 %v4894_v9, %v2311_v8 }
 0xa18   : > { %v2314_v11 = vpop.xlane.xlu1 %2313 }
 0xa19   : > { %v2341_v6 = vmul.f32 1.442695, %v2333_v61  ;;  %v2334_v19 = vsub.f32 %v4905_v50, %v2314_v11 }
 0xa1a   : > { %v2317_v12 = vpop.xlane.xlu0 %2316 }
 0xa1b   : > { %v2335_v17 = vsub.f32 %v4900_v18, %v2317_v12  ;;  %v2343_v21 = vmul.f32 1.442695, %v2334_v19 }
 0xa1d   : > { %v2345_v23 = vmul.f32 1.442695, %v2335_v17 }
 0xa1e   : > { %v2320_v15 = vpop.xlane.xlu0 %2319 }
 0xa1f   : > { %4008 = vpow2.f32 %v2345_v23  ;;  %v2336_v20 = vsub.f32 %v4919_v16, %v2320_v15  ;;  %v2494_v15 = vld [vmem:[%s5271_s22 + $0xc] sm:$0xf] }
 0xa20   : > { %4010 = vpow2.f32 %v2341_v6  ;;  %v2326_v38 = vpop.xlane.xlu1 %2325 }
 0xa21   : > { %v2347_v25 = vmul.f32 1.442695, %v2336_v20  ;;  %v2338_v7 = vsub.f32 %v4932_v57, %v2326_v38 }
 0xa22   : > { %v2323_v29 = vpop.xlane.xlu0 %2322 }
 0xa23   : > { %4012 = vpow2.f32 %v2347_v25  ;;  %v2337_v9 = vsub.f32 %v4927_v10, %v2323_v29  ;;  %v2351_v54 = vmul.f32 1.442695, %v2338_v7  ;;  %v2508_v25 = vsel %vm1676_vm5, %v2494_v15, 0 }
 0xa24   : > { %4014 = vpow2.f32 %v2343_v21  ;;  %v2332_v40 = vpop.xlane.xlu1 %2331 }
 0xa25   : > { %v2349_v18 = vmul.f32 1.442695, %v2337_v9  ;;  %v2340_v3 = vsub.f32 %v4939_v62, %v2332_v40 }
 0xa26   : > { %v2329_v48 = vpop.xlane.xlu0 %2328 }
 0xa27   : > { %v2339_v31 = vsub.f32 %v2303_v13, %v2329_v48  ;;  %v2355_v13 = vmul.f32 1.442695, %v2340_v3 }
 0xa29   : > { %v4972_v35 = vpop.eup %4008  ;;  %v2353_v58 = vmul.f32 1.442695, %v2339_v31 }
 0xa2a   : > { %v2363_v50 = vsel %vm1186_vm4, %v4972_v35, 0.0  ;;  %v4976_v59 = vpop.eup %4010 }
 0xa2b   : > { %4016 = vpow2.f32 %v2353_v58  ;;  %2364 = vadd.xlane.f32.xlu0 %v2363_v50  ;;  %v2357_v34 = vsel %vm1186_vm4, %v4976_v59, 0.0 }
 0xa2c   : > { %4018 = vpow2.f32 %v2349_v18 }
 0xa2d   : > { %v4978_v16 = vpop.eup %4012  ;;  %4020 = vpow2.f32 %v2355_v13 }
 0xa2e   : > { %v2366_v63 = vsel %vm1186_vm4, %v4978_v16, 0.0  ;;  %v4015_v60 = vpop.eup %4014  ;;  %4022 = vpow2.f32 %v2351_v54  ;;  %v3374_v54 = vld [vmem:[%s593_s21] ss:$0 sm:$0xff] }
 0xa2f   : > { %2358 = vadd.xlane.f32.xlu0 %v2357_v34  ;;  %2367 = vadd.xlane.f32.xlu1 %v2366_v63  ;;  %v2360_v39 = vsel %vm1186_vm4, %v4015_v60, 0.0 }
 0xa33   : > { %2361 = vadd.xlane.f32.xlu1 %v2360_v39 }
 0xa35   : > { %v4985_v24 = vpop.eup %4016 }
 0xa36   : > { %v2375_v26 = vsel %vm1186_vm4, %v4985_v24, 0.0  ;;  %v4989_v10 = vpop.eup %4018 }
 0xa37   : > { %2376 = vadd.xlane.f32.xlu0 %v2375_v26  ;;  %v2369_v42 = vsel %vm1186_vm4, %v4989_v10, 0.0  ;;  %v4998_v28 = vpop.eup %4020 }
 0xa38   : > { %v2378_v52 = vsel %vm1186_vm4, %v4998_v28, 0.0 }
 0xa3b   : > { %2370 = vadd.xlane.f32.xlu0 %v2369_v42 }
 0xa44   : > { %2403 = vrot.lane.b32.xlu1 %v4453_v36, %s4143_s3  ;;  %v5002_v36 = vpop.eup %4022 }
 0xa48   : > { %2405 = vrot.lane.b32.xlu1 %v4463_v47, %s4143_s3 }
 0xa51   : > { %2401 = vrot.lane.b32.xlu0 %v4455_v37, %s4143_s3  ;;  %v2372_v37 = vsel %vm1186_vm4, %v5002_v36, 0.0 }
 0xa6c   : > { %2379 = vadd.xlane.f32.xlu1 %v2378_v52  ;;  %v4080_v52 = vld [vmem:[#allocation2 + $0x10] sm:$0xff] }
 0xa70   : > { %2373 = vadd.xlane.f32.xlu1 %v2372_v37  ;;  %v4081_v37 = vld [vmem:[#allocation2] sm:$0xff] }
 0xa81   : > { %2407 = vrot.lane.b32.xlu1 %v4461_v46, %s4143_s3 }
 0xa8c   : > { %v3636_v47 = vpop.f32.mrb[32].mxu1 }
 0xa8d   : > { %v2080_v57 = vpop.f32.mrb[33].mxu1 }
 0xa8e   : > { %v3637_v62 = vpop.f32.mrb[34].mxu1 }
 0xa8f   : > { %v2112_v43 = vpack.c.bf16 %v3637_v62, %v3636_v47  ;;  %v2083_v22 = vpop.f32.mrb[35].mxu1 }
 0xa90   : > { %v2111_v1 = vpack.c.bf16 %v2083_v22, %v2080_v57  ;;  %v4082_v22 = vld [vmem:[#allocation2 + $0x8] sm:$0xff] }
 0xa92   : > { %3644 = vmatprep.mubr.msk.bf16.mxu1 %vm1096_vm3, %v2111_v1 }
 0xa93   : > { %3645 = vmatmul.mubr.msk.bf16.vlgmr.msra.gmra.mrb[24].mxu1 %vm1096_vm3, %v2112_v43 }
 0xa94   : > { %v3640_v44 = vpop.f32.mrb[36].mxu1 }
 0xa95   : > { %v2096_v27 = vpop.f32.mrb[37].mxu1 }
 0xa96   : > { %v3641_v45 = vpop.f32.mrb[38].mxu1 }
 0xa97   : > { %v2114_v51 = vpack.c.bf16 %v3641_v45, %v3640_v44  ;;  %v2099_v33 = vpop.f32.mrb[39].mxu1 }
 0xa98   : > { %v2113_v0 = vpack.c.bf16 %v2099_v33, %v2096_v27  ;;  %v4083_v27 = vld [vmem:[#allocation2 + $0x18] sm:$0xff] }
 0xa9a   : > { %3648 = vmatprep.mubr.msk.bf16.mxu1 %vm1096_vm3, %v2113_v0 }
 0xa9b   : > { %3649 = vmatmul.mubr.msk.bf16.gmra.mrb[28].mxu1 %vm1096_vm3, %v2114_v51 }
 0xab8   : > { %v2365_v46 = vpop.xlane.xlu0 %2364 }
 0xabc   : > { %v2368_v53 = vpop.xlane.xlu1 %2367  ;;  %v2359_v14 = vpop.xlane.xlu0 %2358 }
 0xabd   : > { %4024 = vrcp.f32 %v2359_v14 }
 0xac0   : > { %v2362_v55 = vpop.xlane.xlu1 %2361 }
 0xac1   : > { %4026 = vrcp.f32 %v2362_v55  ;;  %v4084_v55 = vld [vmem:[#allocation2 + $0x20] sm:$0xff] }
 0xac2   : > { %4028 = vrcp.f32 %v2368_v53 }
 0xac3   : > { %4030 = vrcp.f32 %v2365_v46 }
 0xac4   : > { %v2377_v41 = vpop.xlane.xlu0 %2376  ;;  %v2404_v49 = vpop.permute.xlu1 %2403 }
 0xac7   : > { %v4025_v32 = vpop.eup %4024 }
 0xac8   : > { %v2371_v4 = vpop.xlane.xlu0 %2370  ;;  %v2389_v2 = vmul.f32 %v4025_v32, %v4976_v59  ;;  %v2406_v61 = vpop.permute.xlu1 %2405 }
 0xacb   : > { %v4027_v56 = vpop.eup %4026 }
 0xacc   : > { %v2402_v30 = vpop.permute.xlu0 %2401  ;;  %v2390_v5 = vmul.f32 %v4027_v56, %v4015_v60  ;;  %v4029_v12 = vpop.eup %4028 }
 0xacd   : > { %3668 = vmatprep.subr.bf16.mxu1 %v2402_v30  ;;  %v4031_v6 = vpop.eup %4030  ;;  %v2392_v19 = vmul.f32 %v4029_v12, %v4978_v16 }
 0xace   : > { %3669 = vmatpush3.bf16.msra.mxu1 %v2402_v30  ;;  %v2397_v8 = vpack.c.bf16 %v2390_v5, %v2389_v2  ;;  %v2391_v20 = vmul.f32 %v4031_v6, %v4972_v35  ;;  %v4086_v2 = vld [vmem:[#allocation2 + $0x28] sm:$0xff] }
 0xacf   : > { %3670 = vmatprep.subr.bf16.mxu1 %v2404_v49 }
 0xad0   : > { %3676 = vmatprep.mubr.msk.bf16.mxu1 %vm1186_vm4, %v2397_v8  ;;  %v2398_v21 = vpack.c.bf16 %v2392_v19, %v2391_v20  ;;  %v4087_v8 = vld [vmem:[#allocation2 + $0x30] sm:$0xff] }
 0xad2   : > { %3671 = vmatpush3.bf16.msra.mxu1 %v2404_v49  ;;  %v4085_v49 = vld [vmem:[#allocation2 + $0x38] sm:$0xff] }
 0xad3   : > { %3672 = vmatprep.subr.bf16.mxu1 %v2406_v61 }
 0xad6   : > { %3673 = vmatpush3.bf16.msra.mxu1 %v2406_v61 }
 0xaf9   : > { %v2380_v11 = vpop.xlane.xlu1 %2379 }
 0xafa   : > { %4032 = vrcp.f32 %v2380_v11 }
 0xafb   : > { %4034 = vrcp.f32 %v2371_v4 }
 0xafc   : > { %4036 = vrcp.f32 %v2377_v41 }
 0xafd   : > { %v2374_v17 = vpop.xlane.xlu1 %2373 }
 0xafe   : > { %4038 = vrcp.f32 %v2374_v17 }
 0xb01   : > { %v2408_v23 = vpop.permute.xlu1 %2407 }
 0xb02   : > { %3674 = vmatprep.subr.bf16.mxu1 %v2408_v23 }
 0xb03   : > { %3675 = vmatpush3.bf16.msra.mxu1 %v2408_v23 }
 0xb04   : > { %3805 = vmatprep.subr.msk.bf16.mxu1 %vm1676_vm5, %v2494_v15  ;;  %v4033_v29 = vpop.eup %4032 }
 0xb05   : > { %v4035_v9 = vpop.eup %4034  ;;  %v2396_v18 = vmul.f32 %v4033_v29, %v4998_v28 }
 0xb06   : > { %3677 = vmatmul.mubr.msk.bf16.vlgmr.msra.gmra.mrb[40].mxu1 %vm1186_vm4, %v2398_v21  ;;  %v4037_v48 = vpop.eup %4036  ;;  %v2393_v58 = vmul.f32 %v4035_v9, %v4989_v10 }
 0xb07   : > { %3685 = vmatpush3.bf16.msra.mxu1 %v2508_v25  ;;  %v2395_v50 = vmul.f32 %v4037_v48, %v4985_v24 }
 0xb08   : > { %v4039_v31 = vpop.eup %4038 }
 0xb09   : > { %v2394_v35 = vmul.f32 %v4039_v31, %v5002_v36  ;;  %v2400_v16 = vpack.c.bf16 %v2396_v18, %v2395_v50 }
 0xb0b   : > { %v2399_v59 = vpack.c.bf16 %v2394_v35, %v2393_v58 }
 0xb0d   : > { %3680 = vmatprep.mubr.msk.bf16.mxu1 %vm1186_vm4, %v2399_v59 }
 0xb0e   : > { %3681 = vmatmul.mubr.msk.bf16.gmra.mrb[44].mxu1 %vm1186_vm4, %v2400_v16 }
 0xbd9   : > { %v3678_v34 = vpop.f32.mrb[40].mxu1 }
 0xbda   : > { %v2459_v63 = vpop.f32.mrb[41].mxu1 }
 0xbdb   : > { %v3679_v60 = vpop.f32.mrb[42].mxu1 }
 0xbdc   : > { %v2491_v39 = vpack.c.bf16 %v3679_v60, %v3678_v34  ;;  %v2462_v26 = vpop.f32.mrb[43].mxu1 }
 0xbdd   : > { %v2490_v42 = vpack.c.bf16 %v2462_v26, %v2459_v63 }
 0xbdf   : > { %3686 = vmatprep.mubr.msk.bf16.mxu1 %vm1096_vm3, %v2490_v42 }
 0xbe0   : > { %3687 = vmatmul.mubr.msk.bf16.vlgmr.msra.gmra.mrb[24].mxu1 %vm1096_vm3, %v2491_v39 }
 0xbe1   : > { %v3682_v10 = vpop.f32.mrb[44].mxu1 }
 0xbe2   : > { %v2475_v38 = vpop.f32.mrb[45].mxu1 }
 0xbe3   : > { %v3683_v24 = vpop.f32.mrb[46].mxu1 }
 0xbe4   : > { %v2493_v40 = vpack.c.bf16 %v3683_v24, %v3682_v10  ;;  %v2478_v3 = vpop.f32.mrb[47].mxu1 }
 0xbe5   : > { %v2492_v7 = vpack.c.bf16 %v2478_v3, %v2475_v38 }
 0xbe7   : > { %3690 = vmatprep.mubr.msk.bf16.mxu1 %vm1096_vm3, %v2492_v7 }
 0xbe8   : > { %3691 = vmatmul.mubr.msk.bf16.gmra.mrb[28].mxu1 %vm1096_vm3, %v2493_v40 }
 0xcb3   : > { %v3688_v13 = vpop.f32.mrb[24].mxu1 }
 0xcb4   : > { %v2544_v28 = vpop.f32.mrb[25].mxu1  ;;  %v2585_v36 = vadd.f32 %v4080_v52, %v3688_v13 }
 0xcb5   : > { %v2583_v47 = vadd.f32 %v4081_v37, %v2544_v28  ;;  %v3689_v57 = vpop.f32.mrb[26].mxu1 }
 0xcb6   : > { %v2547_v62 = vpop.f32.mrb[27].mxu1  ;;  %v5036_v44 = vadd.f32 %v3374_v54, %v2585_v36  ;;  %v2586_v45 = vadd.f32 %v4083_v27, %v3689_v57 }
 0xcb7   : > { %v5034_v43 = vadd.f32 %v3374_v54, %v2583_v47  ;;  %v2584_v1 = vadd.f32 %v4082_v22, %v2547_v62 }
 0xcb8   : > { %v5044_v14 = vadd.f32 %v3374_v54, %v2586_v45  ;;  %v2612_v32 = vsel %vm870_vm2, %v5036_v44, 0.0 }
 0xcb9   : > { %v5038_v51 = vadd.f32 %v3374_v54, %v2584_v1  ;;  %v2606_v33 = vsel %vm870_vm2, %v5034_v43, 0.0 }
 0xcba   : > { %2607 = vadd.xlane.f32.xlu0 %v2606_v33  ;;  %v2615_v17 = vsel %vm870_vm2, %v5044_v14, 0.0 }
 0xcbb   : > { %v3692_v0 = vpop.f32.mrb[28].mxu1  ;;  %v2609_v46 = vsel %vm870_vm2, %v5038_v51, 0.0 }
 0xcbc   : > { %2610 = vadd.xlane.f32.xlu1 %v2609_v46  ;;  %v2560_v53 = vpop.f32.mrb[29].mxu1  ;;  %v2589_v61 = vadd.f32 %v4087_v8, %v3692_v0 }
 0xcbd   : > { %v2587_v41 = vadd.f32 %v4084_v55, %v2560_v53  ;;  %v3693_v4 = vpop.f32.mrb[30].mxu1  ;;  %v3886_v55 = vld [vmem:[%s4284_s0] sm:$0xff]  }
 0xcbe   : > { %2613 = vadd.xlane.f32.xlu0 %v2612_v32  ;;  %v2563_v56 = vpop.f32.mrb[31].mxu1  ;;  %v2590_v30 = vadd.f32 %v4085_v49, %v3693_v4  ;;  %v5058_v23 = vadd.f32 %v3374_v54, %v2589_v61  ;;  %3694 = vmatprep.subr.bf16.mxu0 %v3886_v55 }
 0xcbf   : > { %v2588_v5 = vadd.f32 %v4086_v2, %v2563_v56  ;;  %v5048_v11 = vadd.f32 %v3374_v54, %v2587_v41  ;;  %3695 = vmatpush3.bf16.msra.mxu0 %v3886_v55  ;;  %v3887_v41 = vld [vmem:[%s4284_s0 + $0x8] sm:$0xff]  }
 0xcc0   : > { %v5054_v6 = vadd.f32 %v3374_v54, %v2590_v30  ;;  %v2624_v21 = vsel %vm870_vm2, %v5058_v23, 0.0  ;;  %3696 = vmatprep.subr.bf16.mxu0 %v3887_v41 }
 0xcc1   : > { %v5050_v12 = vadd.f32 %v3374_v54, %v2588_v5  ;;  %v2618_v15 = vsel %vm870_vm2, %v5048_v11, 0.0 }
 0xcc2   : > { %2616 = vadd.xlane.f32.xlu0 %v2615_v17  ;;  %v2627_v20 = vsel %vm870_vm2, %v5054_v6, 0.0 }
 0xcc3   : > { %v2621_v19 = vsel %vm870_vm2, %v5050_v12, 0.0  ;;  %3697 = vmatpush3.bf16.msra.mxu0 %v3887_v41 }
 0xcc4   : > { %2622 = vadd.xlane.f32.xlu1 %v2621_v19 }
 0xcc6   : > { %2619 = vadd.xlane.f32.xlu0 %v2618_v15 }
 0xcc8   : > { %2628 = vadd.xlane.f32.xlu1 %v2627_v20 }
 0xcca   : > { %2625 = vadd.xlane.f32.xlu0 %v2624_v21 }
 0xd47   : > { %v2608_v25 = vpop.xlane.xlu0 %2607 }
 0xd48   : > { %v2630_v29 = vmul.f32 0.03125, %v2608_v25 }
 0xd49   : > { %v2611_v9 = vpop.xlane.xlu1 %2610 }
 0xd4a   : > { %v5067_v48 = vsub.f32 %v5034_v43, %v2630_v29  ;;  %v2631_v31 = vmul.f32 0.03125, %v2611_v9 }
 0xd4b   : > { %v2614_v18 = vpop.xlane.xlu0 %2613 }
 0xd4c   : > { %v5070_v58 = vsub.f32 %v5038_v51, %v2631_v31  ;;  %v2632_v35 = vmul.f32 0.03125, %v2614_v18  ;;  %v2646_v50 = vmul.f32 %v5067_v48, %v5067_v48 }
 0xd4e   : > { %v5075_v59 = vsub.f32 %v5036_v44, %v2632_v35  ;;  %v2654_v16 = vsel %vm870_vm2, %v2646_v50, 0.0  ;;  %v2647_v34 = vmul.f32 %v5070_v58, %v5070_v58 }
 0xd4f   : > { %v2617_v63 = vpop.xlane.xlu0 %2616  ;;  %2655 = vadd.xlane.f32.xlu0 %v2654_v16 }
 0xd50   : > { %v2633_v60 = vmul.f32 0.03125, %v2617_v63  ;;  %v2657_v39 = vsel %vm870_vm2, %v2647_v34, 0.0  ;;  %v2648_v26 = vmul.f32 %v5075_v59, %v5075_v59 }
 0xd51   : > { %2658 = vadd.xlane.f32.xlu1 %v2657_v39  ;;  %v2623_v42 = vpop.xlane.xlu1 %2622 }
 0xd52   : > { %v5084_v10 = vsub.f32 %v5044_v14, %v2633_v60  ;;  %v2635_v38 = vmul.f32 0.03125, %v2623_v42  ;;  %v2660_v24 = vsel %vm870_vm2, %v2648_v26, 0.0 }
 0xd53   : > { %2661 = vadd.xlane.f32.xlu0 %v2660_v24  ;;  %v2620_v40 = vpop.xlane.xlu0 %2619 }
 0xd54   : > { %v5088_v3 = vsub.f32 %v5050_v12, %v2635_v38  ;;  %v2634_v7 = vmul.f32 0.03125, %v2620_v40  ;;  %v2649_v13 = vmul.f32 %v5084_v10, %v5084_v10 }
 0xd55   : > { %v2629_v54 = vpop.xlane.xlu1 %2628 }
 0xd56   : > { %v5093_v28 = vsub.f32 %v5048_v11, %v2634_v7  ;;  %v2637_v52 = vmul.f32 0.03125, %v2629_v54  ;;  %v2663_v36 = vsel %vm870_vm2, %v2649_v13, 0.0  ;;  %v2651_v37 = vmul.f32 %v5088_v3, %v5088_v3 }
 0xd57   : > { %v2626_v47 = vpop.xlane.xlu0 %2625  ;;  %2664 = vadd.xlane.f32.xlu1 %v2663_v36 }
 0xd58   : > { %v5099_v57 = vsub.f32 %v5054_v6, %v2637_v52  ;;  %v2636_v62 = vmul.f32 0.03125, %v2626_v47  ;;  %v2650_v22 = vmul.f32 %v5093_v28, %v5093_v28  ;;  %v2669_v45 = vsel %vm870_vm2, %v2651_v37, 0.0 }
 0xd5a   : > { %v5104_v1 = vsub.f32 %v5058_v23, %v2636_v62  ;;  %v2666_v27 = vsel %vm870_vm2, %v2650_v22, 0.0  ;;  %v2653_v33 = vmul.f32 %v5099_v57, %v5099_v57 }
 0xd5b   : > { %2667 = vadd.xlane.f32.xlu0 %v2666_v27  ;;  %2670 = vadd.xlane.f32.xlu1 %v2669_v45  ;;  %v3888_v27 = vld [vmem:[%s4298_s12] sm:$0xff]   ;;  %v3893_v45 = vld [vmem:[%s4298_s12 + $0x28] sm:$0xff]  }
 0xd5c   : > { %v2652_v0 = vmul.f32 %v5104_v1, %v5104_v1  ;;  %v2675_v53 = vsel %vm870_vm2, %v2653_v33, 0.0  ;;  %3706 = vmatprep.subr.bf16.mxu0 %v3888_v27  ;;  %v3894_v33 = vld [vmem:[%s4298_s12 + $0x30] sm:$0xff]  }
 0xd5e   : > { %v2672_v46 = vsel %vm870_vm2, %v2652_v0, 0.0  ;;  %v3895_v0 = vld [vmem:[%s4298_s12 + $0x38] sm:$0xff]  }
 0xd5f   : > { %2673 = vadd.xlane.f32.xlu0 %v2672_v46  ;;  %2676 = vadd.xlane.f32.xlu1 %v2675_v53  ;;  %v3375_v46 = vld [vmem:[%s601_s4] ss:$0 sm:$0xff] }
 0xddc   : > { %v2656_v4 = vpop.xlane.xlu0 %2655 }
 0xddd   : > { %v2678_v32 = vmul.f32 0.03125, %v2656_v4 }
 0xdde   : > { %v2659_v56 = vpop.xlane.xlu1 %2658 }
 0xddf   : > { %v2686_v49 = vadd.f32 1e-06, %v2678_v32  ;;  %v2679_v30 = vmul.f32 0.03125, %v2659_v56 }
 0xde0   : > { %v2662_v2 = vpop.xlane.xlu0 %2661 }
 0xde1   : > { %4040 = vrsqrt.f32 %v2686_v49  ;;  %v2687_v5 = vadd.f32 1e-06, %v2679_v30  ;;  %v2680_v8 = vmul.f32 0.03125, %v2662_v2 }
 0xde3   : > { %4042 = vrsqrt.f32 %v2687_v5  ;;  %v2688_v61 = vadd.f32 1e-06, %v2680_v8 }
 0xde4   : > { %v2665_v17 = vpop.xlane.xlu1 %2664 }
 0xde5   : > { %v2681_v19 = vmul.f32 0.03125, %v2665_v17  ;;  %4044 = vrsqrt.f32 %v2688_v61 }
 0xde7   : > { %v2689_v15 = vadd.f32 1e-06, %v2681_v19 }
 0xde8   : > { %v2668_v20 = vpop.xlane.xlu0 %2667  ;;  %v2671_v21 = vpop.xlane.xlu1 %2670 }
 0xde9   : > { %4046 = vrsqrt.f32 %v2689_v15  ;;  %v2682_v25 = vmul.f32 0.03125, %v2668_v20  ;;  %v2683_v29 = vmul.f32 0.03125, %v2671_v21 }
 0xdeb   : > { %v4041_v9 = vpop.eup %4040  ;;  %v2690_v31 = vadd.f32 1e-06, %v2682_v25  ;;  %v2691_v18 = vadd.f32 1e-06, %v2683_v29 }
 0xdec   : > { %v2674_v35 = vpop.xlane.xlu0 %2673  ;;  %v2677_v50 = vpop.xlane.xlu1 %2676  ;;  %v2702_v60 = vmul.f32 %v4041_v9, %v5067_v48 }
 0xded   : > { %v4043_v16 = vpop.eup %4042  ;;  %4048 = vrsqrt.f32 %v2690_v31  ;;  %v2684_v34 = vmul.f32 0.03125, %v2674_v35  ;;  %v2685_v63 = vmul.f32 0.03125, %v2677_v50 }
 0xdee   : > { %4050 = vrsqrt.f32 %v2691_v18  ;;  %v2703_v39 = vmul.f32 %v4043_v16, %v5070_v58 }
 0xdef   : > { %v2692_v26 = vadd.f32 1e-06, %v2684_v34  ;;  %v2693_v42 = vadd.f32 1e-06, %v2685_v63  ;;  %v4045_v24 = vpop.eup %4044 }
 0xdf0   : > { %v2710_v38 = vpack.c.bf16 %v2703_v39, %v2702_v60  ;;  %v2704_v7 = vmul.f32 %v4045_v24, %v5075_v59 }
 0xdf1   : > { %4052 = vrsqrt.f32 %v2692_v26 }
 0xdf2   : > { %4054 = vrsqrt.f32 %v2693_v42  ;;  %3698 = vmatprep.mubr.msk.bf16.mxu0 %vm870_vm2, %v2710_v38 }
 0xdf3   : > { %v4047_v40 = vpop.eup %4046 }
 0xdf4   : > { %v2705_v13 = vmul.f32 %v4047_v40, %v5084_v10 }
 0xdf6   : > { %v2711_v54 = vpack.c.bf16 %v2705_v13, %v2704_v7 }
 0xdf7   : > { %v4049_v52 = vpop.eup %4048 }
 0xdf8   : > { %v4051_v48 = vpop.eup %4050  ;;  %3699 = vmatmul.mubr.msk.bf16.vlgmr.msra.gmra.mrb[32].mxu0 %vm870_vm2, %v2711_v54  ;;  %v2706_v58 = vmul.f32 %v4049_v52, %v5093_v28  ;;  %v3890_v28 = vld [vmem:[%s4298_s12 + $0x10] sm:$0xff]  }
 0xdf9   : > { %v2707_v36 = vmul.f32 %v4051_v48, %v5088_v3  ;;  %3707 = vmatpush3.bf16.msra.mxu0 %v3888_v27  ;;  %v3889_v3 = vld [vmem:[%s4298_s12 + $0x8] sm:$0xff]  }
 0xdfa   : > { %3708 = vmatprep.subr.bf16.mxu0 %v3889_v3 }
 0xdfb   : > { %v4053_v37 = vpop.eup %4052  ;;  %v2712_v47 = vpack.c.bf16 %v2707_v36, %v2706_v58 }
 0xdfc   : > { %v4055_v62 = vpop.eup %4054  ;;  %v2708_v59 = vmul.f32 %v4053_v37, %v5104_v1  ;;  %v3891_v1 = vld [vmem:[%s4298_s12 + $0x18] sm:$0xff]  }
 0xdfd   : > { %3702 = vmatprep.mubr.msk.bf16.mxu0 %vm870_vm2, %v2712_v47  ;;  %v2709_v10 = vmul.f32 %v4055_v62, %v5099_v57  ;;  %3709 = vmatpush3.bf16.msra.mxu0 %v3889_v3  ;;  %v3892_v57 = vld [vmem:[%s4298_s12 + $0x20] sm:$0xff]  }
 0xdfe   : > { %3710 = vmatprep.subr.bf16.mxu0 %v3890_v28 }
 0xdff   : > { %v2713_v22 = vpack.c.bf16 %v2709_v10, %v2708_v59 }
 0xe01   : > { %3703 = vmatmul.mubr.msk.bf16.gmra.mrb[36].mxu0 %vm870_vm2, %v2713_v22 }
 0xe02   : > { %3711 = vmatpush3.bf16.msra.mxu0 %v3890_v28 }
 0xe03   : > { %3712 = vmatprep.subr.bf16.mxu0 %v3891_v1 }
 0xe06   : > { %3713 = vmatpush3.bf16.msra.mxu0 %v3891_v1 }
 0xe07   : > { %3714 = vmatprep.subr.bf16.mxu0 %v3892_v57 }
 0xe0a   : > { %3715 = vmatpush3.bf16.msra.mxu0 %v3892_v57 }
 0xe0b   : > { %3716 = vmatprep.subr.bf16.mxu0 %v3893_v45 }
 0xe0e   : > { %3717 = vmatpush3.bf16.msra.mxu0 %v3893_v45 }
 0xe0f   : > { %3718 = vmatprep.subr.bf16.mxu0 %v3894_v33 }
 0xe12   : > { %3719 = vmatpush3.bf16.msra.mxu0 %v3894_v33 }
 0xe13   : > { %3720 = vmatprep.subr.bf16.mxu0 %v3895_v0 }
 0xe16   : > { %3721 = vmatpush3.bf16.msra.mxu0 %v3895_v0 }
 0xecb   : > { %v3700_v53 = vpop.f32.mrb[32].mxu0 }
 0xecc   : > { %v5141_v55 = vadd.f32 %v3700_v53, %v3375_v46  ;;  %v2783_v41 = vpop.f32.mrb[33].mxu0 }
 0xecd   : > { %v5143_v4 = vadd.f32 %v3375_v46, %v2783_v41  ;;  %v3701_v32 = vpop.f32.mrb[34].mxu0 }
 0xece   : > { %v2824_v56 = vmul.f32 0.044715, %v5141_v55  ;;  %v5146_v49 = vadd.f32 %v3701_v32, %v3375_v46  ;;  %v2786_v30 = vpop.f32.mrb[35].mxu0 }
 0xecf   : > { %v2822_v2 = vmul.f32 0.044715, %v5143_v4  ;;  %v5149_v5 = vadd.f32 %v3375_v46, %v2786_v30 }
 0xed0   : > { %v2832_v8 = vmul.f32 %v2824_v56, %v5141_v55  ;;  %v2825_v61 = vmul.f32 0.044715, %v5146_v49 }
 0xed1   : > { %v2830_v17 = vmul.f32 %v2822_v2, %v5143_v4  ;;  %v2823_v19 = vmul.f32 0.044715, %v5149_v5 }
 0xed2   : > { %v2840_v15 = vmul.f32 %v2832_v8, %v5141_v55  ;;  %v2833_v20 = vmul.f32 %v2825_v61, %v5146_v49  ;;  %v2816_v8 = vmul.f32 0.5, %v5141_v55  ;;  %v2817_v61 = vmul.f32 0.5, %v5146_v49 }
 0xed3   : > { %v2838_v21 = vmul.f32 %v2830_v17, %v5143_v4  ;;  %v2831_v25 = vmul.f32 %v2823_v19, %v5149_v5  ;;  %v2814_v19 = vmul.f32 0.5, %v5143_v4 }
 0xed4   : > { %v2848_v29 = vadd.f32 %v2840_v15, %v5141_v55  ;;  %v2841_v9 = vmul.f32 %v2833_v20, %v5146_v49  ;;  %v3704_v31 = vpop.f32.mrb[36].mxu0  ;;  %v2815_v15 = vmul.f32 0.5, %v5149_v5 }
 0xed5   : > { %v2839_v18 = vmul.f32 %v2831_v25, %v5149_v5  ;;  %v5162_v35 = vadd.f32 %v3704_v31, %v3375_v46  ;;  %v2799_v50 = vpop.f32.mrb[37].mxu0  ;;  %v2846_v16 = vadd.f32 %v2838_v21, %v5143_v4 }
 0xed6   : > { %v2856_v34 = vmul.f32 0.7978846, %v2848_v29  ;;  %v2849_v63 = vadd.f32 %v2841_v9, %v5146_v49  ;;  %v5166_v60 = vadd.f32 %v3375_v46, %v2799_v50  ;;  %v3705_v39 = vpop.f32.mrb[38].mxu0 }
 0xed7   : > { %v2828_v26 = vmul.f32 0.044715, %v5162_v35  ;;  %v2811_v42 = vadd.f32 %v3705_v39, %v3375_v46  ;;  %v2802_v38 = vpop.f32.mrb[39].mxu0  ;;  %v2847_v24 = vadd.f32 %v2839_v18, %v5149_v5  ;;  %v2854_v40 = vmul.f32 0.7978846, %v2846_v16 }
 0xed8   : > { %4056 = vtanh.f32 %v2856_v34  ;;  %v2857_v7 = vmul.f32 0.7978846, %v2849_v63  ;;  %v2826_v13 = vmul.f32 0.044715, %v5166_v60  ;;  %v2803_v54 = vadd.f32 %v3375_v46, %v2802_v38 }
 0xed9   : > { %v2836_v52 = vmul.f32 %v2828_v26, %v5162_v35  ;;  %v2829_v48 = vmul.f32 0.044715, %v2811_v42  ;;  %v2855_v58 = vmul.f32 0.7978846, %v2847_v24  ;;  %4058 = vtanh.f32 %v2854_v40 }
 0xeda   : > { %4060 = vtanh.f32 %v2857_v7  ;;  %v2834_v36 = vmul.f32 %v2826_v13, %v5166_v60  ;;  %v2827_v37 = vmul.f32 0.044715, %v2803_v54  ;;  %v2820_v4 = vmul.f32 0.5, %v5162_v35 }
 0xedb   : > { %v2844_v47 = vmul.f32 %v2836_v52, %v5162_v35  ;;  %v2837_v62 = vmul.f32 %v2829_v48, %v2811_v42  ;;  %4062 = vtanh.f32 %v2855_v58  ;;  %v2821_v39 = vmul.f32 0.5, %v2811_v42 }
 0xedc   : > { %v2842_v59 = vmul.f32 %v2834_v36, %v5166_v60  ;;  %v2835_v10 = vmul.f32 %v2827_v37, %v2803_v54  ;;  %v2818_v26 = vmul.f32 0.5, %v5166_v60  ;;  %v2819_v38 = vmul.f32 0.5, %v2803_v54  ;;  %v3382_v36 = vld [vmem:[%s609_s13] ss:$0 sm:$0xff] }
 0xedd   : > { %v2845_v22 = vmul.f32 %v2837_v62, %v2811_v42  ;;  %v2852_v27 = vadd.f32 %v2844_v47, %v5162_v35 }
 0xede   : > { %v2843_v3 = vmul.f32 %v2835_v10, %v2803_v54  ;;  %v2850_v28 = vadd.f32 %v2842_v59, %v5166_v60 }
 0xedf   : > { %v2853_v1 = vadd.f32 %v2845_v22, %v2811_v42  ;;  %v2860_v57 = vmul.f32 0.7978846, %v2852_v27 }
 0xee0   : > { %v2851_v45 = vadd.f32 %v2843_v3, %v2803_v54  ;;  %v2858_v33 = vmul.f32 0.7978846, %v2850_v28 }
 0xee1   : > { %v2861_v0 = vmul.f32 0.7978846, %v2853_v1  ;;  %4064 = vtanh.f32 %v2860_v57 }
 0xee2   : > { %v4057_v46 = vpop.eup %4056  ;;  %v2859_v53 = vmul.f32 0.7978846, %v2851_v45  ;;  %4066 = vtanh.f32 %v2858_v33 }
 0xee3   : > { %v4059_v41 = vpop.eup %4058  ;;  %v2872_v32 = vadd.f32 1.0, %v4057_v46  ;;  %4068 = vtanh.f32 %v2861_v0 }
 0xee4   : > { %v4061_v56 = vpop.eup %4060  ;;  %v2870_v30 = vadd.f32 1.0, %v4059_v41  ;;  %4070 = vtanh.f32 %v2859_v53 }
 0xee5   : > { %v4063_v2 = vpop.eup %4062  ;;  %v2873_v17 = vadd.f32 1.0, %v4061_v56  ;;  %v2880_v21 = vmul.f32 %v2872_v32, %v2816_v8 }
 0xee6   : > { %v2871_v20 = vadd.f32 1.0, %v4063_v2  ;;  %v2878_v29 = vmul.f32 %v2870_v30, %v2814_v19 }
 0xee7   : > { %v2881_v25 = vmul.f32 %v2873_v17, %v2817_v61  ;;  %v4144_v61 = vmov (!%p3391_p8), 0.0   ;;  %v4089_v17 = vld [vmem:[%s5272_s26 + $0x8] sm:$0xff] (!%p3391_p8)  }
 0xee8   : > { %v2879_v9 = vmul.f32 %v2871_v20, %v2815_v15  ;;  %3730 = vmatprep.subr.bf16.mxu0 (!%p3391_p8), %v4144_v61 }
 0xee9   : > { %v2887_v31 = vpack.c.bf16 %v2881_v25, %v2880_v21 }
 0xeea   : > { %v2886_v18 = vpack.c.bf16 %v2879_v9, %v2878_v29  ;;  %v3392_v9 = vld [vmem:[%s5273_s15] ss:$0 sm:$0xff] (!%p3391_p8) }
 0xeeb   : > { %v4065_v50 = vpop.eup %4064 }
 0xeec   : > { %v4067_v16 = vpop.eup %4066  ;;  %3722 = vmatprep.mubr.bf16.mxu0 %v2886_v18  ;;  %v2876_v34 = vadd.f32 1.0, %v4065_v50 }
 0xeed   : > { %v4069_v63 = vpop.eup %4068  ;;  %3723 = vmatmul.mubr.bf16.vlgmr.msra.gmra.mrb[40].mxu0 %v2887_v31  ;;  %v2874_v55 = vadd.f32 1.0, %v4067_v16 }
 0xeee   : > { %v4071_v49 = vpop.eup %4070  ;;  %v2877_v5 = vadd.f32 1.0, %v4069_v63  ;;  %v2884_v40 = vmul.f32 %v2876_v34, %v2820_v4 }
 0xeef   : > { %v2875_v24 = vadd.f32 1.0, %v4071_v49  ;;  %v2882_v13 = vmul.f32 %v2874_v55, %v2818_v26 }
 0xef0   : > { %v2885_v7 = vmul.f32 %v2877_v5, %v2821_v39 }
 0xef1   : > { %v2883_v52 = vmul.f32 %v2875_v24, %v2819_v38 }
 0xef2   : > { %v2889_v48 = vpack.c.bf16 %v2885_v7, %v2884_v40 }
 0xef3   : > { %v2888_v58 = vpack.c.bf16 %v2883_v52, %v2882_v13 }
 0xef5   : > { %3726 = vmatprep.mubr.bf16.mxu0 %v2888_v58 }
 0xef6   : > { %3727 = vmatmul.mubr.bf16.gmra.mrb[44].mxu0 %v2889_v48 }
 0xef7   : > { %3734 = vmatprep.mubr.msk.bf16.mxu0 (!%p3391_p8), %vm4145_vm6, %v4144_v61 }
 0xfc0   : > { %v3724_v35 = vpop.f32.mrb[40].mxu0 }
 0xfc1   : > { %v3004_v42 = vadd.f32 %v3724_v35, %v3382_v36  ;;  %v2995_v37 = vpop.f32.mrb[41].mxu0 }
 0xfc2   : > { %v2996_v47 = vadd.f32 %v3382_v36, %v2995_v37  ;;  %v3725_v60 = vpop.f32.mrb[42].mxu0 }
 0xfc3   : > { %v3028_v54 = vadd.f32 %v3004_v42, %v5036_v44  ;;  %v3007_v62 = vadd.f32 %v3725_v60, %v3382_v36  ;;  %v2998_v59 = vpop.f32.mrb[43].mxu0 }
 0xfc4   : > { %v3026_v10 = vadd.f32 %v2996_v47, %v5034_v43  ;;  %v2999_v22 = vadd.f32 %v3382_v36, %v2998_v59 }
 0xfc5   : > { %3036 = vst.msk [vmem:[#allocation2 + $0x10] sm:$0xff] %vm870_vm2, %v3028_v54  ;;  %v3029_v27 = vadd.f32 %v3007_v62, %v5044_v14 }
 0xfc6   : > { %3034 = vst.msk [vmem:[#allocation2] sm:$0xff] %vm870_vm2, %v3026_v10  ;;  %v3027_v3 = vadd.f32 %v2999_v22, %v5038_v51 }
 0xfc7   : > { %3037 = vst.msk [vmem:[#allocation2 + $0x18] sm:$0xff] %vm870_vm2, %v3029_v27 }
 0xfc8   : > { %3035 = vst.msk [vmem:[#allocation2 + $0x8] sm:$0xff] %vm870_vm2, %v3027_v3 }
 0xfc9   : > { %v3728_v28 = vpop.f32.mrb[44].mxu0 }
 0xfca   : > { %v3020_v1 = vadd.f32 %v3728_v28, %v3382_v36  ;;  %v3011_v44 = vpop.f32.mrb[45].mxu0 }
 0xfcb   : > { %v3012_v57 = vadd.f32 %v3382_v36, %v3011_v44  ;;  %v3729_v45 = vpop.f32.mrb[46].mxu0  ;;  %3045 = sbr.rel (%p3391_p8) target bundleno = 4585 (0x11e9), region = 84 }
 0xfcc   : > { %v3032_v43 = vadd.f32 %v3020_v1, %v5058_v23  ;;  %v3023_v33 = vadd.f32 %v3729_v45, %v3382_v36  ;;  %v3014_v0 = vpop.f32.mrb[47].mxu0 }
 0xfcd   : > { %v3030_v46 = vadd.f32 %v3012_v57, %v5048_v11  ;;  %v3015_v14 = vadd.f32 %v3382_v36, %v3014_v0 }
 0xfce   : > { %3040 = vst.msk [vmem:[#allocation2 + $0x30] sm:$0xff] %vm870_vm2, %v3032_v43  ;;  %v3033_v51 = vadd.f32 %v3023_v33, %v5054_v6 }
 0xfcf   : > { %3038 = vst.msk [vmem:[#allocation2 + $0x20] sm:$0xff] %vm870_vm2, %v3030_v46  ;;  %v3031_v53 = vadd.f32 %v3015_v14, %v5050_v12  ;;  %v3046_v23 = vld [vmem:[#allocation2] ss:$8 sm:$0xf] (!%p3391_p8) }
 0xfd0   : > { %3041 = vst.msk [vmem:[#allocation2 + $0x38] sm:$0xff] %vm870_vm2, %v3033_v51  ;;  %v4088_v12 = vld [vmem:[%s5272_s26] sm:$0xff] (!%p3391_p8)  }
 0xfd1   : > { %3039 = vst.msk [vmem:[#allocation2 + $0x28] sm:$0xff] %vm870_vm2, %v3031_v53  ;;  %3731 = vmatpush3.bf16.msra.mxu0 (!%p3391_p8), %v4088_v12 }
 0xfd2   : > { %3732 = vmatprep.subr.bf16.mxu0 %v4144_v61 }
 0xfd5   : > { %3733 = vmatpush3.bf16.msra.mxu0 %v4089_v17 }
 0xfd8   : > { %v3047_v41 = vld [vmem:[#allocation2] ss:$8 sm:$0xf0] }
 0xfd9   : > { %v3048_v32 = vor.u32 %v3047_v41, %v3046_v23 }
 0xfdb   : > { %v3049_v11 = vsel %vm870_vm2, %v3048_v32, 0.0 }
 0xfdc   : > { %3050 = vadd.xlane.f32.xlu0 %v3049_v11 }
0x1069   : > { %v3051_v56 = vpop.xlane.xlu0 %3050 }
0x106a   : > { %v3052_v30 = vmul.f32 0.03125, %v3051_v56 }
0x106c   : > { %v3053_v6 = vsub.f32 %v3048_v32, %v3052_v30 }
0x106e   : > { %v3054_v2 = vmul.f32 %v3053_v6, %v3053_v6 }
0x1070   : > { %v3055_v8 = vsel %vm870_vm2, %v3054_v2, 0.0 }
0x1071   : > { %3056 = vadd.xlane.f32.xlu0 %v3055_v8 }
0x10fe   : > { %v3057_v19 = vpop.xlane.xlu0 %3056 }
0x10ff   : > { %v3058_v15 = vmul.f32 0.03125, %v3057_v19 }
0x1101   : > { %v3059_v20 = vadd.f32 1e-06, %v3058_v15 }
0x1103   : > { %4090 = vrsqrt.f32 %v3059_v20 }
0x110d   : > { %v4091_v21 = vpop.eup %4090 }
0x110e   : > { %v3061_v25 = vmul.f32 %v4091_v21, %v3053_v6 }
0x1110   : > { %v3062_v29 = vpack.c.bf16 %v3061_v25, %v3061_v25 }
0x1112   : > { %3735 = vmatmul.mubr.msk.bf16.vlgmr.msra.gmra.mrb[0].mxu0 %vm870_vm2, %v3062_v29 }
0x11e5   : > { %v3123_v31 = vpop.f32.mrb[0].mxu0 }
0x11e6   : > { %v3124_v18 = vadd.f32 %v3392_v9, %v3123_v31  ;;  %v3736_v50 = vpop.f32.mrb[1].mxu0 }
0x11e7   : > { %v3126_v16 = vpop.f32.mrb[2].mxu0 }
0x11e8   : > { %3129 = vst [vmem:[%s4303_s23] sm:$0xff] %v3124_v18  ;;  %v3737_v34 = vpop.f32.mrb[3].mxu0 }
0x11e9 PF: > { %s5274_s27 = sld [smem:[#allocation5_spill]]  ;;  %s5275_s29 = sld [smem:[#allocation3_spill]] }
0x11ea   : > { %s5276_s30 = sld [smem:[#allocation4_spill]]  ;;  %s5277_s15 = sld [smem:[#allocation6_spill]] }
0x11eb   : > { %s5278_s16 = sld [smem:[#allocation7_spill]] }
0x11ef   : > { %s24_s17 = sadd.s32 1, %s5274_s27  }
0x11f0   : > { %p21_p9 = scmp.ge.s32.totalorder %s24_s17, 10  }
0x11f2   :  { %23 = sbr.rel (!%p21_p9) target bundleno = 7 (0x7), region = 138 }

</bundles_post_ra>
